<compile_context>
chip_gen: v7x
topology: tpu7x:2x2x1
jax: 0.10.0
libtpu: 0.0.40
codegen_flags: <defaults>
</compile_context>

<pallas_src>
import jax
import jax.numpy as jnp
from jax.experimental import pallas as pl
from jax.experimental.pallas import tpu as pltpu


def graph_learn_kernel(x_ref, a_ref, s_ref, dl_ref, fn_ref):
    # x_ref : (C, V, F) VMEM  — chunk of C flattened (b, t) slices
    # a_ref : (F,)      SMEM  — GraphLearn `a` parameter (one scalar per feature)
    # s_ref : (C, V, V) VMEM  — adjacency chunk S
    # dl_ref, fn_ref : (1, 1, 1) VMEM — per-chunk loss partials
    C, V, F = x_ref.shape
    x = x_ref[...].astype(jnp.float32)                      # (C, V, F)

    # w[c, i, j] = sum_f a[f] * |x[c, i, f] - x[c, j, f]|
    # Static f-loop keeps the working set at one lane-dense (C, V, V) tile
    # instead of materializing a (C, V, V, F) intermediate with F on lanes.
    w = jnp.zeros((C, V, V), dtype=jnp.float32)
    for f in range(F):                                      # F is small & static
        col = x[:, :, f]                                    # (C, V)
        d = col[:, :, None] - col[:, None, :]               # (C, V, V)
        w = w + a_ref[f] * jnp.abs(d)                       # scalar SMEM read * VPU

    # diff_sq[c, i, j] = ||x_i - x_j||^2 via the Gram identity (MXU matmul).
    gram = jnp.einsum("cif,cjf->cij", x, x,
                      preferred_element_type=jnp.float32)   # (C, V, V)
    nrm = jnp.sum(x * x, axis=-1)                           # (C, V)
    diff_sq = nrm[:, :, None] + nrm[:, None, :] - 2.0 * gram

    # exp + L1-normalize over j == softmax over j; subtracting the row max is a
    # mathematically exact stabilization.  exp > 0 and the diagonal term is
    # exp(0) = 1, so the row sum is >= 1 and F.normalize's 1e-12 clamp (and the
    # abs()) are never active.
    m = jnp.max(w, axis=-1, keepdims=True)                  # (C, V, 1)  (XLU)
    e = jnp.exp(w - m)                                      # (C, V, V)  (EUP)
    denom = jnp.sum(e, axis=-1, keepdims=True)              # (C, V, 1)
    inv = pl.reciprocal(denom, approx=True)                 # EUP slot (cheap)
    inv = inv * (2.0 - denom * inv)                         # 1 Newton step -> ~f32 exact
    S = e * inv                                             # (C, V, V)
    s_ref[...] = S.astype(s_ref.dtype)

    dl_ref[...] = jnp.sum(diff_sq * S, keepdims=True)       # (1, 1, 1)
    fn_ref[...] = jnp.sum(S * S, keepdims=True)             # (1, 1, 1)


def _pick_chunk(n_slices, v, f, vmem_budget_bytes=12 << 20):
    """Largest divisor of n_slices whose per-step VMEM footprint fits the budget,
    preferring >= 2 grid steps so the parallel axis can shard across 2 TCs."""
    # Pipeline buffers: 2x input tile (C,V,F) + 2x output tile (C,V,V), f32.
    pipeline_bytes = 4 * (2 * v * f + 2 * v * v)
    # In-kernel working set: x copy + ~5 live (C,V,V) f32 temps (w/e/S/gram/diff_sq).
    work_bytes = 4 * (v * f + 5 * v * v)
    per_slice_bytes = pipeline_bytes + work_bytes
    cap = max(1, vmem_budget_bytes // per_slice_bytes)
    divisors = [c for c in range(1, n_slices + 1)
                if n_slices % c == 0 and c <= cap]
    if not divisors:
        return 1
    two_step = [c for c in divisors if n_slices // c >= 2]
    return max(two_step) if two_step else max(divisors)


def graph_learn_pallas(x, a, alpha=0.1):
    """x: (B, T, V, F) float32, a: (F, 1) float32 (the GraphLearn parameter)."""
    B, T, V, F = x.shape
    N = B * T
    C = _pick_chunk(N, V, F)
    G = N // C

    x_flat = x.reshape(N, V, F)
    a_vec = a.reshape(F).astype(jnp.float32)

    out_shapes = (
        jax.ShapeDtypeStruct((N, V, V), jnp.float32),   # S, flattened over (b, t)
        jax.ShapeDtypeStruct((G, 1, 1), jnp.float32),   # per-chunk diff-loss partial
        jax.ShapeDtypeStruct((G, 1, 1), jnp.float32),   # per-chunk sum(S^2) partial
    )

    S_flat, dl_p, fn_p = pl.pallas_call(
        graph_learn_kernel,
        out_shape=out_shapes,
        grid=(G,),
        in_specs=[
            pl.BlockSpec((C, V, F), lambda g: (g, 0, 0)),
            pl.BlockSpec(memory_space=pltpu.MemorySpace.SMEM),
        ],
        out_specs=(
            pl.BlockSpec((C, V, V), lambda g: (g, 0, 0)),
            pl.BlockSpec((1, 1, 1), lambda g: (g, 0, 0)),
            pl.BlockSpec((1, 1, 1), lambda g: (g, 0, 0)),
        ),
        compiler_params=pltpu.CompilerParams(
            dimension_semantics=("parallel",)),
    )(x_flat, a_vec)

    S = S_flat.reshape(B, T, V, V)
    # diff_loss = sum_t mean_b( sum_{i,j} diff_sq * S ) = (1/B) * sum over (b, t)
    diff_loss = jnp.sum(dl_p) / B
    f_norm_loss = alpha * jnp.sum(fn_p)
    return S, diff_loss, f_norm_loss


def compute_edge_index_dense(S):
    """JAX equivalent of compute_edge_index: S is strictly positive (softmax),
    so torch.nonzero yields every (i, j) pair in row-major order."""
    B, T, V, _ = S.shape
    ii, jj = jnp.meshgrid(jnp.arange(V, dtype=jnp.int32),
                          jnp.arange(V, dtype=jnp.int32), indexing="ij")
    edge_index = jnp.stack([ii.reshape(-1), jj.reshape(-1)], axis=0)      # (2, V*V)
    edge_index = jnp.broadcast_to(edge_index, (B, T, 2, V * V))
    edge_weight = S.reshape(B, T, V * V).astype(jnp.float32)
    return edge_index, edge_weight


def _graph_learn_ref(x, a, alpha=0.1):
    """Pure-JAX reference of GraphLearn.forward (intended semantics)."""
    diff = x[:, :, :, None, :] - x[:, :, None, :, :]          # (B,T,V,V,F)
    w = jnp.einsum("btijf,fc->btijc", jnp.abs(diff), a)[..., 0]
    tmpS = jnp.exp(w)
    denom = jnp.maximum(jnp.sum(jnp.abs(tmpS), axis=-1, keepdims=True), 1e-12)
    S = tmpS / denom
    diff_sq = jnp.sum(diff ** 2, axis=-1)
    local = jnp.sum(diff_sq * S, axis=(2, 3))                  # (B, T)
    diff_loss = jnp.sum(jnp.mean(local, axis=0))
    f_norm_loss = alpha * jnp.sum(S ** 2)
    return S, diff_loss, f_norm_loss


if __name__ == "__main__":
    key = jax.random.PRNGKey(0)
    kx, ka = jax.random.split(key)

    # Small shapes implied by the forward: x is (B, T, V, F)
    B, T, V, F = 2, 4, 8, 16
    x = jax.random.normal(kx, (B, T, V, F), dtype=jnp.float32)
    # GraphLearn parameter a ~ randn(F, 1), deterministic init
    a = jax.random.normal(ka, (F, 1), dtype=jnp.float32)
    alpha = 0.1

    S, diff_loss, f_norm_loss = graph_learn_pallas(x, a, alpha=alpha)
    edge_index, edge_weight = compute_edge_index_dense(S)
    jax.block_until_ready((S, diff_loss, f_norm_loss, edge_index, edge_weight))

    # Correctness check against a pure-JAX reference.
    S_r, dl_r, fn_r = _graph_learn_ref(x, a, alpha=alpha)
    assert jnp.allclose(S, S_r, rtol=1e-4, atol=1e-4)
    assert jnp.allclose(diff_loss, dl_r, rtol=2e-3, atol=1e-2)
    assert jnp.allclose(f_norm_loss, fn_r, rtol=1e-3, atol=1e-4)
    # Row sums of S must be 1 (L1 normalization) and all weights positive.
    assert jnp.allclose(jnp.sum(S, axis=-1), 1.0, atol=1e-4)
    assert bool(jnp.all(edge_weight > 0))

    print("KERNEL_OK")
</pallas_src>

<mosaic_0001>
module attributes {stable_mosaic.version = 11 : i64} {
  func.func @graph_learn_kernel(%arg0: i32, %arg1: memref<4x8x16xf32, #tpu.memory_space<vmem>>, %arg2: memref<16xf32, #tpu.memory_space<smem>>, %arg3: memref<4x8x8xf32, #tpu.memory_space<vmem>>, %arg4: memref<1x1x1xf32, #tpu.memory_space<vmem>>, %arg5: memref<1x1x1xf32, #tpu.memory_space<vmem>>) attributes {dimension_semantics = [#tpu.dimension_semantics<parallel>], iteration_bounds = array<i64: 2>, scalar_prefetch = 0 : i64, scratch_operands = 0 : i64, tpu.core_type = #tpu.core_type<tc>, window_params = [{transform_indices = @transform_0, window_bounds = array<i64: 4, 8, 16>}, {transform_indices = @transform_1, window_bounds = array<i64: 16>}, {transform_indices = @transform_2, window_bounds = array<i64: 4, 8, 8>}, {transform_indices = @transform_3, window_bounds = array<i64: 1, 1, 1>}, {transform_indices = @transform_4, window_bounds = array<i64: 1, 1, 1>}]} {
    %c0 = arith.constant 0 : index
    %c0_0 = arith.constant 0 : index
    %c0_1 = arith.constant 0 : index
    %0 = vector.load %arg1[%c0, %c0_0, %c0_1] : memref<4x8x16xf32, #tpu.memory_space<vmem>>, vector<4x8x16xf32>
    %cst = arith.constant 0.000000e+00 : f32
    %1 = vector.broadcast %cst : f32 to vector<4x8x8xf32>
    %2 = vector.extract_strided_slice %0 {offsets = [0, 0, 0], sizes = [4, 8, 1], strides = [1, 1, 1]} : vector<4x8x16xf32> to vector<4x8x1xf32>
    %3 = vector.shape_cast %2 : vector<4x8x1xf32> to vector<4x8xf32>
    %4 = vector.shape_cast %3 : vector<4x8xf32> to vector<4x8x1xf32>
    %5 = vector.shape_cast %3 : vector<4x8xf32> to vector<4x1x8xf32>
    %6 = vector.broadcast %4 : vector<4x8x1xf32> to vector<4x8x8xf32>
    %7 = vector.broadcast %5 : vector<4x1x8xf32> to vector<4x8x8xf32>
    %8 = arith.subf %6, %7 : vector<4x8x8xf32>
    %c0_2 = arith.constant 0 : index
    %9 = memref.load %arg2[%c0_2] : memref<16xf32, #tpu.memory_space<smem>>
    %10 = math.absf %8 : vector<4x8x8xf32>
    %11 = vector.broadcast %9 : f32 to vector<4x8x8xf32>
    %12 = arith.mulf %11, %10 : vector<4x8x8xf32>
    %13 = arith.addf %1, %12 : vector<4x8x8xf32>
    %14 = vector.extract_strided_slice %0 {offsets = [0, 0, 1], sizes = [4, 8, 1], strides = [1, 1, 1]} : vector<4x8x16xf32> to vector<4x8x1xf32>
    %15 = vector.shape_cast %14 : vector<4x8x1xf32> to vector<4x8xf32>
    %16 = vector.shape_cast %15 : vector<4x8xf32> to vector<4x8x1xf32>
    %17 = vector.shape_cast %15 : vector<4x8xf32> to vector<4x1x8xf32>
    %18 = vector.broadcast %16 : vector<4x8x1xf32> to vector<4x8x8xf32>
    %19 = vector.broadcast %17 : vector<4x1x8xf32> to vector<4x8x8xf32>
    %20 = arith.subf %18, %19 : vector<4x8x8xf32>
    %c1 = arith.constant 1 : index
    %21 = memref.load %arg2[%c1] : memref<16xf32, #tpu.memory_space<smem>>
    %22 = math.absf %20 : vector<4x8x8xf32>
    %23 = vector.broadcast %21 : f32 to vector<4x8x8xf32>
    %24 = arith.mulf %23, %22 : vector<4x8x8xf32>
    %25 = arith.addf %13, %24 : vector<4x8x8xf32>
    %26 = vector.extract_strided_slice %0 {offsets = [0, 0, 2], sizes = [4, 8, 1], strides = [1, 1, 1]} : vector<4x8x16xf32> to vector<4x8x1xf32>
    %27 = vector.shape_cast %26 : vector<4x8x1xf32> to vector<4x8xf32>
    %28 = vector.shape_cast %27 : vector<4x8xf32> to vector<4x8x1xf32>
    %29 = vector.shape_cast %27 : vector<4x8xf32> to vector<4x1x8xf32>
    %30 = vector.broadcast %28 : vector<4x8x1xf32> to vector<4x8x8xf32>
    %31 = vector.broadcast %29 : vector<4x1x8xf32> to vector<4x8x8xf32>
    %32 = arith.subf %30, %31 : vector<4x8x8xf32>
    %c2 = arith.constant 2 : index
    %33 = memref.load %arg2[%c2] : memref<16xf32, #tpu.memory_space<smem>>
    %34 = math.absf %32 : vector<4x8x8xf32>
    %35 = vector.broadcast %33 : f32 to vector<4x8x8xf32>
    %36 = arith.mulf %35, %34 : vector<4x8x8xf32>
    %37 = arith.addf %25, %36 : vector<4x8x8xf32>
    %38 = vector.extract_strided_slice %0 {offsets = [0, 0, 3], sizes = [4, 8, 1], strides = [1, 1, 1]} : vector<4x8x16xf32> to vector<4x8x1xf32>
    %39 = vector.shape_cast %38 : vector<4x8x1xf32> to vector<4x8xf32>
    %40 = vector.shape_cast %39 : vector<4x8xf32> to vector<4x8x1xf32>
    %41 = vector.shape_cast %39 : vector<4x8xf32> to vector<4x1x8xf32>
    %42 = vector.broadcast %40 : vector<4x8x1xf32> to vector<4x8x8xf32>
    %43 = vector.broadcast %41 : vector<4x1x8xf32> to vector<4x8x8xf32>
    %44 = arith.subf %42, %43 : vector<4x8x8xf32>
    %c3 = arith.constant 3 : index
    %45 = memref.load %arg2[%c3] : memref<16xf32, #tpu.memory_space<smem>>
    %46 = math.absf %44 : vector<4x8x8xf32>
    %47 = vector.broadcast %45 : f32 to vector<4x8x8xf32>
    %48 = arith.mulf %47, %46 : vector<4x8x8xf32>
    %49 = arith.addf %37, %48 : vector<4x8x8xf32>
    %50 = vector.extract_strided_slice %0 {offsets = [0, 0, 4], sizes = [4, 8, 1], strides = [1, 1, 1]} : vector<4x8x16xf32> to vector<4x8x1xf32>
    %51 = vector.shape_cast %50 : vector<4x8x1xf32> to vector<4x8xf32>
    %52 = vector.shape_cast %51 : vector<4x8xf32> to vector<4x8x1xf32>
    %53 = vector.shape_cast %51 : vector<4x8xf32> to vector<4x1x8xf32>
    %54 = vector.broadcast %52 : vector<4x8x1xf32> to vector<4x8x8xf32>
    %55 = vector.broadcast %53 : vector<4x1x8xf32> to vector<4x8x8xf32>
    %56 = arith.subf %54, %55 : vector<4x8x8xf32>
    %c4 = arith.constant 4 : index
    %57 = memref.load %arg2[%c4] : memref<16xf32, #tpu.memory_space<smem>>
    %58 = math.absf %56 : vector<4x8x8xf32>
    %59 = vector.broadcast %57 : f32 to vector<4x8x8xf32>
    %60 = arith.mulf %59, %58 : vector<4x8x8xf32>
    %61 = arith.addf %49, %60 : vector<4x8x8xf32>
    %62 = vector.extract_strided_slice %0 {offsets = [0, 0, 5], sizes = [4, 8, 1], strides = [1, 1, 1]} : vector<4x8x16xf32> to vector<4x8x1xf32>
    %63 = vector.shape_cast %62 : vector<4x8x1xf32> to vector<4x8xf32>
    %64 = vector.shape_cast %63 : vector<4x8xf32> to vector<4x8x1xf32>
    %65 = vector.shape_cast %63 : vector<4x8xf32> to vector<4x1x8xf32>
    %66 = vector.broadcast %64 : vector<4x8x1xf32> to vector<4x8x8xf32>
    %67 = vector.broadcast %65 : vector<4x1x8xf32> to vector<4x8x8xf32>
    %68 = arith.subf %66, %67 : vector<4x8x8xf32>
    %c5 = arith.constant 5 : index
    %69 = memref.load %arg2[%c5] : memref<16xf32, #tpu.memory_space<smem>>
    %70 = math.absf %68 : vector<4x8x8xf32>
    %71 = vector.broadcast %69 : f32 to vector<4x8x8xf32>
    %72 = arith.mulf %71, %70 : vector<4x8x8xf32>
    %73 = arith.addf %61, %72 : vector<4x8x8xf32>
    %74 = vector.extract_strided_slice %0 {offsets = [0, 0, 6], sizes = [4, 8, 1], strides = [1, 1, 1]} : vector<4x8x16xf32> to vector<4x8x1xf32>
    %75 = vector.shape_cast %74 : vector<4x8x1xf32> to vector<4x8xf32>
    %76 = vector.shape_cast %75 : vector<4x8xf32> to vector<4x8x1xf32>
    %77 = vector.shape_cast %75 : vector<4x8xf32> to vector<4x1x8xf32>
    %78 = vector.broadcast %76 : vector<4x8x1xf32> to vector<4x8x8xf32>
    %79 = vector.broadcast %77 : vector<4x1x8xf32> to vector<4x8x8xf32>
    %80 = arith.subf %78, %79 : vector<4x8x8xf32>
    %c6 = arith.constant 6 : index
    %81 = memref.load %arg2[%c6] : memref<16xf32, #tpu.memory_space<smem>>
    %82 = math.absf %80 : vector<4x8x8xf32>
    %83 = vector.broadcast %81 : f32 to vector<4x8x8xf32>
    %84 = arith.mulf %83, %82 : vector<4x8x8xf32>
    %85 = arith.addf %73, %84 : vector<4x8x8xf32>
    %86 = vector.extract_strided_slice %0 {offsets = [0, 0, 7], sizes = [4, 8, 1], strides = [1, 1, 1]} : vector<4x8x16xf32> to vector<4x8x1xf32>
    %87 = vector.shape_cast %86 : vector<4x8x1xf32> to vector<4x8xf32>
    %88 = vector.shape_cast %87 : vector<4x8xf32> to vector<4x8x1xf32>
    %89 = vector.shape_cast %87 : vector<4x8xf32> to vector<4x1x8xf32>
    %90 = vector.broadcast %88 : vector<4x8x1xf32> to vector<4x8x8xf32>
    %91 = vector.broadcast %89 : vector<4x1x8xf32> to vector<4x8x8xf32>
    %92 = arith.subf %90, %91 : vector<4x8x8xf32>
    %c7 = arith.constant 7 : index
    %93 = memref.load %arg2[%c7] : memref<16xf32, #tpu.memory_space<smem>>
    %94 = math.absf %92 : vector<4x8x8xf32>
    %95 = vector.broadcast %93 : f32 to vector<4x8x8xf32>
    %96 = arith.mulf %95, %94 : vector<4x8x8xf32>
    %97 = arith.addf %85, %96 : vector<4x8x8xf32>
    %98 = vector.extract_strided_slice %0 {offsets = [0, 0, 8], sizes = [4, 8, 1], strides = [1, 1, 1]} : vector<4x8x16xf32> to vector<4x8x1xf32>
    %99 = vector.shape_cast %98 : vector<4x8x1xf32> to vector<4x8xf32>
    %100 = vector.shape_cast %99 : vector<4x8xf32> to vector<4x8x1xf32>
    %101 = vector.shape_cast %99 : vector<4x8xf32> to vector<4x1x8xf32>
    %102 = vector.broadcast %100 : vector<4x8x1xf32> to vector<4x8x8xf32>
    %103 = vector.broadcast %101 : vector<4x1x8xf32> to vector<4x8x8xf32>
    %104 = arith.subf %102, %103 : vector<4x8x8xf32>
    %c8 = arith.constant 8 : index
    %105 = memref.load %arg2[%c8] : memref<16xf32, #tpu.memory_space<smem>>
    %106 = math.absf %104 : vector<4x8x8xf32>
    %107 = vector.broadcast %105 : f32 to vector<4x8x8xf32>
    %108 = arith.mulf %107, %106 : vector<4x8x8xf32>
    %109 = arith.addf %97, %108 : vector<4x8x8xf32>
    %110 = vector.extract_strided_slice %0 {offsets = [0, 0, 9], sizes = [4, 8, 1], strides = [1, 1, 1]} : vector<4x8x16xf32> to vector<4x8x1xf32>
    %111 = vector.shape_cast %110 : vector<4x8x1xf32> to vector<4x8xf32>
    %112 = vector.shape_cast %111 : vector<4x8xf32> to vector<4x8x1xf32>
    %113 = vector.shape_cast %111 : vector<4x8xf32> to vector<4x1x8xf32>
    %114 = vector.broadcast %112 : vector<4x8x1xf32> to vector<4x8x8xf32>
    %115 = vector.broadcast %113 : vector<4x1x8xf32> to vector<4x8x8xf32>
    %116 = arith.subf %114, %115 : vector<4x8x8xf32>
    %c9 = arith.constant 9 : index
    %117 = memref.load %arg2[%c9] : memref<16xf32, #tpu.memory_space<smem>>
    %118 = math.absf %116 : vector<4x8x8xf32>
    %119 = vector.broadcast %117 : f32 to vector<4x8x8xf32>
    %120 = arith.mulf %119, %118 : vector<4x8x8xf32>
    %121 = arith.addf %109, %120 : vector<4x8x8xf32>
    %122 = vector.extract_strided_slice %0 {offsets = [0, 0, 10], sizes = [4, 8, 1], strides = [1, 1, 1]} : vector<4x8x16xf32> to vector<4x8x1xf32>
    %123 = vector.shape_cast %122 : vector<4x8x1xf32> to vector<4x8xf32>
    %124 = vector.shape_cast %123 : vector<4x8xf32> to vector<4x8x1xf32>
    %125 = vector.shape_cast %123 : vector<4x8xf32> to vector<4x1x8xf32>
    %126 = vector.broadcast %124 : vector<4x8x1xf32> to vector<4x8x8xf32>
    %127 = vector.broadcast %125 : vector<4x1x8xf32> to vector<4x8x8xf32>
    %128 = arith.subf %126, %127 : vector<4x8x8xf32>
    %c10 = arith.constant 10 : index
    %129 = memref.load %arg2[%c10] : memref<16xf32, #tpu.memory_space<smem>>
    %130 = math.absf %128 : vector<4x8x8xf32>
    %131 = vector.broadcast %129 : f32 to vector<4x8x8xf32>
    %132 = arith.mulf %131, %130 : vector<4x8x8xf32>
    %133 = arith.addf %121, %132 : vector<4x8x8xf32>
    %134 = vector.extract_strided_slice %0 {offsets = [0, 0, 11], sizes = [4, 8, 1], strides = [1, 1, 1]} : vector<4x8x16xf32> to vector<4x8x1xf32>
    %135 = vector.shape_cast %134 : vector<4x8x1xf32> to vector<4x8xf32>
    %136 = vector.shape_cast %135 : vector<4x8xf32> to vector<4x8x1xf32>
    %137 = vector.shape_cast %135 : vector<4x8xf32> to vector<4x1x8xf32>
    %138 = vector.broadcast %136 : vector<4x8x1xf32> to vector<4x8x8xf32>
    %139 = vector.broadcast %137 : vector<4x1x8xf32> to vector<4x8x8xf32>
    %140 = arith.subf %138, %139 : vector<4x8x8xf32>
    %c11 = arith.constant 11 : index
    %141 = memref.load %arg2[%c11] : memref<16xf32, #tpu.memory_space<smem>>
    %142 = math.absf %140 : vector<4x8x8xf32>
    %143 = vector.broadcast %141 : f32 to vector<4x8x8xf32>
    %144 = arith.mulf %143, %142 : vector<4x8x8xf32>
    %145 = arith.addf %133, %144 : vector<4x8x8xf32>
    %146 = vector.extract_strided_slice %0 {offsets = [0, 0, 12], sizes = [4, 8, 1], strides = [1, 1, 1]} : vector<4x8x16xf32> to vector<4x8x1xf32>
    %147 = vector.shape_cast %146 : vector<4x8x1xf32> to vector<4x8xf32>
    %148 = vector.shape_cast %147 : vector<4x8xf32> to vector<4x8x1xf32>
    %149 = vector.shape_cast %147 : vector<4x8xf32> to vector<4x1x8xf32>
    %150 = vector.broadcast %148 : vector<4x8x1xf32> to vector<4x8x8xf32>
    %151 = vector.broadcast %149 : vector<4x1x8xf32> to vector<4x8x8xf32>
    %152 = arith.subf %150, %151 : vector<4x8x8xf32>
    %c12 = arith.constant 12 : index
    %153 = memref.load %arg2[%c12] : memref<16xf32, #tpu.memory_space<smem>>
    %154 = math.absf %152 : vector<4x8x8xf32>
    %155 = vector.broadcast %153 : f32 to vector<4x8x8xf32>
    %156 = arith.mulf %155, %154 : vector<4x8x8xf32>
    %157 = arith.addf %145, %156 : vector<4x8x8xf32>
    %158 = vector.extract_strided_slice %0 {offsets = [0, 0, 13], sizes = [4, 8, 1], strides = [1, 1, 1]} : vector<4x8x16xf32> to vector<4x8x1xf32>
    %159 = vector.shape_cast %158 : vector<4x8x1xf32> to vector<4x8xf32>
    %160 = vector.shape_cast %159 : vector<4x8xf32> to vector<4x8x1xf32>
    %161 = vector.shape_cast %159 : vector<4x8xf32> to vector<4x1x8xf32>
    %162 = vector.broadcast %160 : vector<4x8x1xf32> to vector<4x8x8xf32>
    %163 = vector.broadcast %161 : vector<4x1x8xf32> to vector<4x8x8xf32>
    %164 = arith.subf %162, %163 : vector<4x8x8xf32>
    %c13 = arith.constant 13 : index
    %165 = memref.load %arg2[%c13] : memref<16xf32, #tpu.memory_space<smem>>
    %166 = math.absf %164 : vector<4x8x8xf32>
    %167 = vector.broadcast %165 : f32 to vector<4x8x8xf32>
    %168 = arith.mulf %167, %166 : vector<4x8x8xf32>
    %169 = arith.addf %157, %168 : vector<4x8x8xf32>
    %170 = vector.extract_strided_slice %0 {offsets = [0, 0, 14], sizes = [4, 8, 1], strides = [1, 1, 1]} : vector<4x8x16xf32> to vector<4x8x1xf32>
    %171 = vector.shape_cast %170 : vector<4x8x1xf32> to vector<4x8xf32>
    %172 = vector.shape_cast %171 : vector<4x8xf32> to vector<4x8x1xf32>
    %173 = vector.shape_cast %171 : vector<4x8xf32> to vector<4x1x8xf32>
    %174 = vector.broadcast %172 : vector<4x8x1xf32> to vector<4x8x8xf32>
    %175 = vector.broadcast %173 : vector<4x1x8xf32> to vector<4x8x8xf32>
    %176 = arith.subf %174, %175 : vector<4x8x8xf32>
    %c14 = arith.constant 14 : index
    %177 = memref.load %arg2[%c14] : memref<16xf32, #tpu.memory_space<smem>>
    %178 = math.absf %176 : vector<4x8x8xf32>
    %179 = vector.broadcast %177 : f32 to vector<4x8x8xf32>
    %180 = arith.mulf %179, %178 : vector<4x8x8xf32>
    %181 = arith.addf %169, %180 : vector<4x8x8xf32>
    %182 = vector.extract_strided_slice %0 {offsets = [0, 0, 15], sizes = [4, 8, 1], strides = [1, 1, 1]} : vector<4x8x16xf32> to vector<4x8x1xf32>
    %183 = vector.shape_cast %182 : vector<4x8x1xf32> to vector<4x8xf32>
    %184 = vector.shape_cast %183 : vector<4x8xf32> to vector<4x8x1xf32>
    %185 = vector.shape_cast %183 : vector<4x8xf32> to vector<4x1x8xf32>
    %186 = vector.broadcast %184 : vector<4x8x1xf32> to vector<4x8x8xf32>
    %187 = vector.broadcast %185 : vector<4x1x8xf32> to vector<4x8x8xf32>
    %188 = arith.subf %186, %187 : vector<4x8x8xf32>
    %c15 = arith.constant 15 : index
    %189 = memref.load %arg2[%c15] : memref<16xf32, #tpu.memory_space<smem>>
    %190 = math.absf %188 : vector<4x8x8xf32>
    %191 = vector.broadcast %189 : f32 to vector<4x8x8xf32>
    %192 = arith.mulf %191, %190 : vector<4x8x8xf32>
    %193 = arith.addf %181, %192 : vector<4x8x8xf32>
    "tpu.trace_start"() <{level = 10 : i32, message = "cif,cjf->cij"}> : () -> ()
    %cst_3 = arith.constant dense<0.000000e+00> : vector<4x8x8xf32>
    %194 = tpu.matmul %0, %0, %cst_3 {dimension_numbers = #tpu.dot_dimension_numbers<[2], [2], [1], [1], [0, 0, 0, 1, 1, 1], [0], [0]>} : vector<4x8x16xf32>, vector<4x8x16xf32>, vector<4x8x8xf32> -> vector<4x8x8xf32>
    "tpu.trace_stop"() : () -> ()
    %195 = arith.mulf %0, %0 : vector<4x8x16xf32>
    %cst_4 = arith.constant dense<0.000000e+00> : vector<4x8xf32>
    %196 = vector.multi_reduction <add>, %195, %cst_4 [2] : vector<4x8x16xf32> to vector<4x8xf32>
    %197 = vector.shape_cast %196 : vector<4x8xf32> to vector<4x8x1xf32>
    %198 = vector.shape_cast %196 : vector<4x8xf32> to vector<4x1x8xf32>
    %199 = vector.broadcast %197 : vector<4x8x1xf32> to vector<4x8x8xf32>
    %200 = vector.broadcast %198 : vector<4x1x8xf32> to vector<4x8x8xf32>
    %201 = arith.addf %199, %200 : vector<4x8x8xf32>
    %cst_5 = arith.constant 2.000000e+00 : f32
    %202 = vector.broadcast %cst_5 : f32 to vector<4x8x8xf32>
    %203 = arith.mulf %202, %194 : vector<4x8x8xf32>
    %204 = arith.subf %201, %203 : vector<4x8x8xf32>
    %cst_6 = arith.constant dense<0xFF800000> : vector<4x8xf32>
    %205 = vector.multi_reduction <maximumf>, %193, %cst_6 [2] : vector<4x8x8xf32> to vector<4x8xf32>
    %206 = vector.shape_cast %205 : vector<4x8xf32> to vector<4x8x1xf32>
    %207 = vector.broadcast %206 : vector<4x8x1xf32> to vector<4x8x8xf32>
    %208 = arith.subf %193, %207 : vector<4x8x8xf32>
    %209 = math.exp %208 : vector<4x8x8xf32>
    %cst_7 = arith.constant dense<0.000000e+00> : vector<4x8xf32>
    %210 = vector.multi_reduction <add>, %209, %cst_7 [2] : vector<4x8x8xf32> to vector<4x8xf32>
    %211 = vector.shape_cast %210 : vector<4x8xf32> to vector<4x8x1xf32>
    %212 = tpu.reciprocal %211 {approx = true} : vector<4x8x1xf32> -> vector<4x8x1xf32>
    %213 = arith.mulf %211, %212 : vector<4x8x1xf32>
    %cst_8 = arith.constant 2.000000e+00 : f32
    %214 = vector.broadcast %cst_8 : f32 to vector<4x8x1xf32>
    %215 = arith.subf %214, %213 : vector<4x8x1xf32>
    %216 = arith.mulf %212, %215 : vector<4x8x1xf32>
    %217 = vector.broadcast %216 : vector<4x8x1xf32> to vector<4x8x8xf32>
    %218 = arith.mulf %209, %217 : vector<4x8x8xf32>
    %c0_9 = arith.constant 0 : index
    %c0_10 = arith.constant 0 : index
    %c0_11 = arith.constant 0 : index
    %219 = vector.load %arg3[%c0_9, %c0_10, %c0_11] : memref<4x8x8xf32, #tpu.memory_space<vmem>>, vector<4x8x8xf32>
    tpu.vector_store %arg3[%c0_9, %c0_10, %c0_11], %218 {strides = array<i32>} : memref<4x8x8xf32, #tpu.memory_space<vmem>>, vector<4x8x8xf32>,
    %220 = arith.mulf %204, %218 : vector<4x8x8xf32>
    %221 = vector.shape_cast %220 : vector<4x8x8xf32> to vector<1x4x8x8xf32>
    %cst_12 = arith.constant dense<0.000000e+00> : vector<1xf32>
    %222 = vector.multi_reduction <add>, %221, %cst_12 [1, 2, 3] : vector<1x4x8x8xf32> to vector<1xf32>
    %223 = vector.shape_cast %222 : vector<1xf32> to vector<1x1x1x1xf32>
    %224 = vector.extract %223[0, 0, 0, 0] : f32 from vector<1x1x1x1xf32>
    %225 = vector.broadcast %224 : f32 to vector<1x1x1xf32>
    %c0_13 = arith.constant 0 : index
    %c0_14 = arith.constant 0 : index
    %c0_15 = arith.constant 0 : index
    %226 = vector.load %arg4[%c0_13, %c0_14, %c0_15] : memref<1x1x1xf32, #tpu.memory_space<vmem>>, vector<1x1x1xf32>
    tpu.vector_store %arg4[%c0_13, %c0_14, %c0_15], %225 {strides = array<i32>} : memref<1x1x1xf32, #tpu.memory_space<vmem>>, vector<1x1x1xf32>,
    %227 = arith.mulf %218, %218 : vector<4x8x8xf32>
    %228 = vector.shape_cast %227 : vector<4x8x8xf32> to vector<1x4x8x8xf32>
    %cst_16 = arith.constant dense<0.000000e+00> : vector<1xf32>
    %229 = vector.multi_reduction <add>, %228, %cst_16 [1, 2, 3] : vector<1x4x8x8xf32> to vector<1xf32>
    %230 = vector.shape_cast %229 : vector<1xf32> to vector<1x1x1x1xf32>
    %231 = vector.extract %230[0, 0, 0, 0] : f32 from vector<1x1x1x1xf32>
    %232 = vector.broadcast %231 : f32 to vector<1x1x1xf32>
    %c0_17 = arith.constant 0 : index
    %c0_18 = arith.constant 0 : index
    %c0_19 = arith.constant 0 : index
    %233 = vector.load %arg5[%c0_17, %c0_18, %c0_19] : memref<1x1x1xf32, #tpu.memory_space<vmem>>, vector<1x1x1xf32>
    tpu.vector_store %arg5[%c0_17, %c0_18, %c0_19], %232 {strides = array<i32>} : memref<1x1x1xf32, #tpu.memory_space<vmem>>, vector<1x1x1xf32>,
    return
  }
  func.func @transform_0(%arg0: i32) -> (i32, i32, i32) {
    %c0_i32 = arith.constant 0 : i32
    %c0_i32_0 = arith.constant 0 : i32
    %c0_i32_1 = arith.constant 0 : i32
    return %arg0, %c0_i32, %c0_i32_0 : i32, i32, i32
  }
  func.func @transform_1(%arg0: i32) -> i32 {
    %c0_i32 = arith.constant 0 : i32
    %c0_i32_0 = arith.constant 0 : i32
    return %c0_i32 : i32
  }
  func.func @transform_2(%arg0: i32) -> (i32, i32, i32) {
    %c0_i32 = arith.constant 0 : i32
    %c0_i32_0 = arith.constant 0 : i32
    %c0_i32_1 = arith.constant 0 : i32
    return %arg0, %c0_i32, %c0_i32_0 : i32, i32, i32
  }
  func.func @transform_3(%arg0: i32) -> (i32, i32, i32) {
    %c0_i32 = arith.constant 0 : i32
    %c0_i32_0 = arith.constant 0 : i32
    %c0_i32_1 = arith.constant 0 : i32
    return %arg0, %c0_i32, %c0_i32_0 : i32, i32, i32
  }
  func.func @transform_4(%arg0: i32) -> (i32, i32, i32) {
    %c0_i32 = arith.constant 0 : i32
    %c0_i32_0 = arith.constant 0 : i32
    %c0_i32_1 = arith.constant 0 : i32
    return %arg0, %c0_i32, %c0_i32_0 : i32, i32, i32
  }
}

</mosaic_0001>

<bundles_post_ra>
// kernel: tpu_custom_call.1
= control target key start
LH: loop header
LB: loop body
LE: loop exit
PB: predicated region body
PF: predicated region fallthrough
CT: control target
= control target key end

     0   :  { %10 = vsyncpa [#allocation3], 0  ;;  %s3104_s0 = inlined_call_operand.hbm [shape: f32[8,8,16], index: 0, kind: input, shape index: {}]   ;;  %s3105_s1 = inlined_call_operand.vmem [shape: f32[16], index: 1, kind: input, shape index: {}]   ;;  %s3106_s2 = inlined_call_operand.hbm [shape: f32[8,8,8], index: 2, kind: output, shape index: {0}]   ;;  %s3107_s3 = inlined_call_operand.vmem [shape: f32[2,1,1], index: 3, kind: output, shape index: {1}]   ;;  %s3108_s4 = inlined_call_operand.vmem [shape: f32[2,1,1], index: 4, kind: output, shape index: {2}]  }
   0x1   :  { %12 = vsyncpa [#allocation3 + $0x1], 0 }
   0x2   :  { %13 = vsyncpa [#allocation5], 0 }
   0x3   :  { %14 = vsyncpa [#allocation4], 0 }
   0x4   :  { %16 = vsyncpa [#allocation4 + $0x1], 0  ;;  %s2525_s15 = smov 0   ;;  %s2527_s16 = smov 0  }
   0x5   :  { %s2529_s17 = smov 0   ;;  %s2531_s18 = smov 0  }
   0x6 LB: > { %s2546_s19 = sadd.s32 4294967295, %s2473_s18   ;;  %s2133_s20 = sadd.s32 4294967294, %s2473_s18   ;;  %s2473_s18 = sphi %s2531_s18, %s3128_s18   ;;  %s2469_s17 = sphi %s2529_s17, %s3127_s17   ;;  %s2465_s16 = sphi %s2527_s16, %s3126_s16   ;;  %s2461_s15 = sphi %s2525_s15, %s3125_s15  }
   0x7   : > { %s2550_s21 = sadd.s32 1, %s2473_s18   ;;  %s29_s22 = sadd.s32 1, %s2469_s17 }
   0x8   : > { %s26_s23 = ssub.s32 %s2473_s18, %s2550_s21  ;;  %p36_p0 = scmp.ne.s32.totalorder %s2469_s17, %s2465_s16 }
   0x9   : > { %p27_p1 = scmp.eq.s32.totalorder %s26_s23, 0  ;;  %p37_p2 = scmp.eq.s32.totalorder %s2473_s18, 0 }
   0xa   : > { %p42_p3 = scmp.ne.s32.totalorder %s2465_s16, %s2461_s15  ;;  %p3110_p4 = scmp.eq.s32.totalorder %s2546_s19, 0 }
   0xb   : > { %s2562_s24 = scalar_select %p27_p1, %s2469_s17, %s29_s22  }
   0xc   : > { %p2564_p5 = por %p37_p2, %p36_p0  ;;  %p2570_p6 = por %p3110_p4, %p42_p3 }
   0xd   : > { %p87_p7 = scmp.eq.s32.totalorder %s2546_s19, 1  ;;  %p93_p8 = scmp.eq.s32.totalorder %s2133_s20, 1 }
   0xe   : > { %s3113_s26 = scalar_select %p2570_p6, 1, 0 }
   0xf   : > { %p2134_p9 = scmp.ge.s32.totalorder %s2473_s18, 1  ;;  %p152_p10 = scmp.lt.s32.totalorder %s2473_s18, 3 }
  0x10   : > { %p2577_p11 = por %p87_p7, %p36_p0  ;;  %p2581_p12 = por %p93_p8, %p42_p3 }
  0x11   : > { %p2585_p13 = pnand %p2134_p9, %p152_p10  ;;  %s165_s6 = sshll.u32 %s3105_s1, 4  ;;  %s166_s6 = int_to_ptr.vmem [resolvable:$true] %s165_s6 }
  0x12   : > { %s3114_s27 = scalar_select %p2577_p11, 1, 0 }
  0x13   : > { %s3115_s28 = scalar_select %p2581_p12, 1, 0 }
  0x14   : > { %p2214_p1 = pneg %p2585_p13  ;;  %p2227_p2 = scmp.lt.s32.totalorder %s2473_s18, 2 }
  0x15   : > { %s176_s8 = sand.u32 1, %s2469_s17   ;;  %s2358_s11 = scalar_lea.vmem %s166_s6, 16 }
  0x16   : > { %p2598_p7 = pnand %p2214_p1, %p3110_p4  ;;  %p2605_p3 = pnand %p2227_p2, %p2564_p5 }
  0x17   : > { %s2137_s10 = sshll.u32 %s176_s8, 5  ;;  %p2359_p8 = scmp.ne.s32.totalorder %s166_s6, %s2358_s11 }
  0x18   : > { %p2360_p9 = pneg %p2598_p7  ;;  %p2366_p12 = scmp.lt.s32.totalorder %s166_s6, %s166_s6 }
  0x19   : > { %p2367_p11 = scmp.lt.s32.totalorder %s2358_s11, %s2358_s11 }
  0x1a   : > { %p2361_p10 = pnand %p2360_p9, %p2359_p8 }
  0x1b   : > { %p2368_p1 = por %p2367_p11, %p2366_p12 }
  0x1c   : > { %p2362_p0 = pneg %p2361_p10 }
  0x1e   : > { %p2369_p4 = pnand %p2368_p1, %p2362_p0 }
  0x20   : > { %2372 = shalt.err (!%p2369_p4)
}
  0x21   : > { %s2475_s12 = smov [#allocation6]   ;;  %s2172_s13 = sshll.u32 %s2473_s18, 9 }
  0x22   : > { %2217 = dma.vmem_to_smem (!%p2598_p7), %s166_s6, 16, %s2475_s12, [#allocation5]  }
  0x23   : > { %s180_s14 = scalar_lea.vmem [#allocation2], %s2137_s10  ;;  %s2617_s25 = scalar_lea.hbm %s3104_s0, %s2172_s13 }
  0x24   : > { %s187_s20 = sshll.u32 %s180_s14, 4  ;;  %s2621_s30 = scalar_lea.sflag [#allocation3], %s176_s8  ;;  %s2619_s20 = int_to_ptr.vmem [resolvable:$true] %s187_s20 }
  0x25   : > { %s2373_s5 = scalar_lea.hbm %s2617_s25, 512  ;;  %p2375_p5 = pneg %p2605_p3 }
  0x26   : > { %p2374_p4 = scmp.ne.s32.totalorder %s2617_s25, %s2373_s5  ;;  %s2378_s10 = scalar_lea.hbm %s3104_s0, 1024 }
  0x27   : > { %p2379_p0 = scmp.lt.u32.totalorder %s2617_s25, %s3104_s0  ;;  %p2380_p2 = scmp.lt.u32.totalorder %s2378_s10, %s2373_s5 }
  0x28   : > { %p2376_p11 = pnand %p2375_p5, %p2374_p4  ;;  %p2382_p8 = scmp.lt.u32.totalorder %s2373_s5, %s2617_s25 }
  0x29   : > { %p2381_p7 = por %p2380_p2, %p2379_p0 }
  0x2a   : > { %p2377_p12 = pneg %p2376_p11 }
  0x2b   : > { %p2383_p9 = por %p2382_p8, %p2381_p7 }
  0x2d   : > { %p2384_p10 = pnand %p2383_p9, %p2377_p12 }
  0x2f   : > { %2387 = shalt.err (!%p2384_p10)
}
  0x30   : > { %s2388_s8 = scalar_lea.vmem %s2619_s20, 512  ;;  %s2476_s13 = smov [#allocation2]  }
  0x31   : > { %p2389_p1 = scmp.ne.s32.totalorder %s2619_s20, %s2388_s8  ;;  %s2393_s14 = sshll.u32 %s2476_s13, 4  ;;  %s2394_s14 = int_to_ptr.vmem [resolvable:$false] %s2393_s14 }
  0x32   : > { %s2395_s22 = scalar_lea.vmem %s2394_s14, 1024  ;;  %p2396_p6 = scmp.lt.s32.totalorder %s2619_s20, %s2394_s14 }
  0x33   : > { %p2391_p4 = pnand %p2389_p1, %p2375_p5  ;;  %p2397_p0 = scmp.lt.s32.totalorder %s2395_s22, %s2388_s8 }
  0x35   : > { %p2392_p11 = pneg %p2391_p4  ;;  %p2398_p2 = por %p2397_p0, %p2396_p6 }
  0x37   : > { %p2399_p7 = pnand %p2398_p2, %p2392_p11 }
  0x39   : > { %2402 = shalt.err (!%p2399_p7)
}
  0x3a   : > { %s2477_s23 = smov 128   ;;  %s2478_s5 = smov 8  }
  0x3b   : > { %2221 = dma.hbm_to_vmem [thread:$0]  (!%p2605_p3), %s2617_s25, 512, %s2619_s20, %s2621_s30, %s2477_s23, %s2477_s23, %s2478_s5  }
  0x3c   : > { %199 = sbr.rel (%p2585_p13) target bundleno = 936 (0x3a8), region = 28  ;;  %s2652_s6 = sand.u32 (!%p2585_p13), 1, %s2465_s16  }
  0x3d   : > { %s2141_s7 = sshll.u32 (!%p2585_p13), %s2652_s6, 5  ;;  %s202_s10 = scalar_lea.sflag (!%p2585_p13), [#allocation3], %s2652_s6 }
  0x3e   : > { %s2658_s11 = scalar_lea.vmem (!%p2585_p13), [#allocation2], %s2141_s7  ;;  %p3119_p6 = scmp.ne.s32.totalorder (!%p2585_p13), %s3113_s26, 0 }
  0x43   : > { %2448 = dma.done.wait (%p3119_p6), %s202_s10, 512  }
  0x44   : > { %2450 = vsyncadd (%p3119_p6), %s202_s10, 4294966784  ;;  %p3120_p3 = scmp.eq.s32.totalorder %s2546_s19, 0 }
  0x46   : > { %2452 = dma.done.wait (%p3120_p3), [#allocation5], 16   ;;  %p3121_p13 = pmov %p3120_p3 }
  0x48   : > { %2454 = vsyncadd (%p3121_p13), [#allocation5], 4294967280 }
  0x49   : > { %214 = sfence }
  0x4a   : > { %v2669_v0 = vld [vmem:[%s2658_s11] sm:$0xff]  ;;  %v2479_v1 = vmov 1   ;;  %v2480_v2 = vmov 0   ;;  %v2674_v3 = vld [vmem:[%s2658_s11 + $0x8] sm:$0xff]  ;;  %v2679_v4 = vld [vmem:[%s2658_s11 + $0x10] sm:$0xff]  ;;  %v2481_v5 = vmov 2   ;;  %v273_v20 = vlaneseq }
  0x4b   : > { %2286 = vset.pattern.permute.xlu1 %v2479_v1  ;;  %2285 = vset.pattern.permute.xlu0 %v2480_v2  ;;  %v2686_v6 = vld [vmem:[%s2658_s11 + $0x18] sm:$0xff]  ;;  %v2482_v7 = vmov 3   ;;  %v2483_v8 = vmov 4   ;;  %v2484_v9 = vmov 5   ;;  %v2485_v10 = vmov 6   ;;  %s2144_s26 = sld [smem:[#allocation6 + $0x1]] }
  0x4c   : > { %344 = vperm.xlu1 %2286, %v2669_v0   ;;  %255 = vperm.xlu0 %2285, %v2669_v0   ;;  %v2486_v11 = vmov 7   ;;  %v2487_v12 = vmov 8   ;;  %v2488_v13 = vmov 9   ;;  %v2489_v14 = vmov 10   ;;  %s329_s29 = sld [smem:[#allocation6]]  ;;  %s2145_s9 = sld [smem:[#allocation6 + $0x2]] }
  0x4d   : > { %v2490_v15 = vmov 11   ;;  %v2491_v16 = vmov 12   ;;  %v2492_v17 = vmov 13   ;;  %v2493_v18 = vmov 14   ;;  %s2146_s20 = sld [smem:[#allocation6 + $0x3]]  ;;  %s2147_s25 = sld [smem:[#allocation6 + $0x4]] }
  0x4e   : > { %v2494_v19 = vmov 15   ;;  %v274_v21 = vand.u32 127, %v273_v20  ;;  %v276_v22 = vshrl.u32 %v273_v20, 7  ;;  %s2148_s30 = sld [smem:[#allocation6 + $0x5]]  ;;  %s2149_s12 = sld [smem:[#allocation6 + $0x6]]  ;;  %vm1513_vm0 = vcmask 130048  }
  0x4f   : > { %vm2496_vm1 = vmmov 0   ;;  %s2150_s8 = sld [smem:[#allocation6 + $0x7]]  ;;  %s2151_s13 = sld [smem:[#allocation6 + $0x8]]  ;;  %vm1878_vm2 = vcmask 64512  }
  0x50   : > { %348 = vperm.xlu1 %2286, %v2674_v3   ;;  %260 = vperm.xlu0 %2285, %v2674_v3   ;;  %v2738_v23 = vsub.s32 %v274_v21, %v276_v22  ;;  %s2152_s14 = sld [smem:[#allocation6 + $0x9]]  ;;  %s2153_s22 = sld [smem:[#allocation6 + $0xa]] }
  0x51   : > { %v412_v30 = vstv %s2144_s26  ;;  %s2154_s23 = sld [smem:[#allocation6 + $0xb]]  ;;  %s2155_s5 = sld [smem:[#allocation6 + $0xc]] }
  0x52   : > { %v334_v31 = vstv %s329_s29  ;;  %v490_v63 = vstv %s2145_s9  ;;  %s2156_s10 = sld [smem:[#allocation6 + $0xd]]  ;;  %s2853_s26 = sld [smem:[#allocation6 + $0xe]] }
  0x53   : > { %s2857_s29 = sld [smem:[#allocation6 + $0xf]]  ;;  %p3122_p12 = scmp.ne.s32.totalorder %s3114_s27, 0 }
  0x54   : > { %352 = vperm.xlu1 %2286, %v2679_v4   ;;  %265 = vperm.xlu0 %2285, %v2679_v4  }
  0x58   : > { %2288 = vset.pattern.permute.xlu1 %v2481_v5  ;;  %2287 = vset.pattern.permute.xlu0 %v2481_v5 }
  0x59   : > { %426 = vperm.xlu1 %2288, %v2674_v3   ;;  %422 = vperm.xlu0 %2287, %v2669_v0  }
  0x5d   : > { %2289 = vset.pattern.permute.xlu1 %v2480_v2  ;;  %2290 = vset.pattern.permute.xlu0 %v2479_v1 }
  0x5e   : > { %270 = vperm.xlu1 %2289, %v2686_v6   ;;  %356 = vperm.xlu0 %2290, %v2686_v6  }
  0x62   : > { %2291 = vset.pattern.permute.xlu1 %v2481_v5  ;;  %2293 = vset.pattern.permute.xlu0 %v2482_v7 }
  0x63   : > { %430 = vperm.xlu1 %2291, %v2679_v4   ;;  %504 = vperm.xlu0 %2293, %v2674_v3  }
  0x67   : > { %2292 = vset.pattern.permute.xlu1 %v2482_v7  ;;  %2296 = vset.pattern.permute.xlu0 %v2483_v8 }
  0x68   : > { %500 = vperm.xlu1 %2292, %v2669_v0   ;;  %578 = vperm.xlu0 %2296, %v2669_v0  }
  0x6c   : > { %2294 = vset.pattern.permute.xlu1 %v2481_v5  ;;  %586 = vperm.xlu0 %2296, %v2679_v4  }
  0x6d   : > { %434 = vperm.xlu1 %2294, %v2686_v6  }
  0x70   : > { %2300 = vset.pattern.permute.xlu0 %v2484_v9 }
  0x71   : > { %2295 = vset.pattern.permute.xlu1 %v2482_v7  ;;  %660 = vperm.xlu0 %2300, %v2674_v3  }
  0x72   : > { %508 = vperm.xlu1 %2295, %v2679_v4  }
  0x75   : > { %2303 = vset.pattern.permute.xlu0 %v2485_v10 }
  0x76   : > { %2297 = vset.pattern.permute.xlu1 %v2483_v8  ;;  %734 = vperm.xlu0 %2303, %v2669_v0  }
  0x77   : > { %582 = vperm.xlu1 %2297, %v2674_v3  }
  0x7a   : > { %742 = vperm.xlu0 %2303, %v2679_v4  }
  0x7b   : > { %2298 = vset.pattern.permute.xlu1 %v2482_v7 }
  0x7c   : > { %512 = vperm.xlu1 %2298, %v2686_v6  }
  0x7e   : > { %2307 = vset.pattern.permute.xlu0 %v2486_v11 }
  0x7f   : > { %816 = vperm.xlu0 %2307, %v2674_v3  }
  0x80   : > { %2299 = vset.pattern.permute.xlu1 %v2484_v9 }
  0x81   : > { %656 = vperm.xlu1 %2299, %v2669_v0  }
  0x83   : > { %2310 = vset.pattern.permute.xlu0 %v2487_v12 }
  0x84   : > { %890 = vperm.xlu0 %2310, %v2669_v0  }
  0x85   : > { %2301 = vset.pattern.permute.xlu1 %v2483_v8 }
  0x86   : > { %590 = vperm.xlu1 %2301, %v2686_v6  }
  0x88   : > { %898 = vperm.xlu0 %2310, %v2679_v4  }
  0x8a   : > { %2302 = vset.pattern.permute.xlu1 %v2484_v9 }
  0x8b   : > { %664 = vperm.xlu1 %2302, %v2679_v4  }
  0x8c   : > { %2314 = vset.pattern.permute.xlu0 %v2488_v13 }
  0x8d   : > { %972 = vperm.xlu0 %2314, %v2674_v3  }
  0x8f   : > { %2304 = vset.pattern.permute.xlu1 %v2485_v10 }
  0x90   : > { %738 = vperm.xlu1 %2304, %v2674_v3  }
  0x91   : > { %2317 = vset.pattern.permute.xlu0 %v2489_v14 }
  0x92   : > { %1046 = vperm.xlu0 %2317, %v2669_v0  }
  0x94   : > { %2305 = vset.pattern.permute.xlu1 %v2484_v9 }
  0x95   : > { %668 = vperm.xlu1 %2305, %v2686_v6  }
  0x96   : > { %1054 = vperm.xlu0 %2317, %v2679_v4  }
  0x99   : > { %2306 = vset.pattern.permute.xlu1 %v2486_v11 }
  0x9a   : > { %812 = vperm.xlu1 %2306, %v2669_v0   ;;  %2321 = vset.pattern.permute.xlu0 %v2490_v15 }
  0x9b   : > { %1128 = vperm.xlu0 %2321, %v2674_v3  }
  0x9e   : > { %2308 = vset.pattern.permute.xlu1 %v2485_v10 }
  0x9f   : > { %746 = vperm.xlu1 %2308, %v2686_v6   ;;  %2324 = vset.pattern.permute.xlu0 %v2491_v16 }
  0xa0   : > { %1202 = vperm.xlu0 %2324, %v2669_v0  }
  0xa3   : > { %2309 = vset.pattern.permute.xlu1 %v2486_v11 }
  0xa4   : > { %820 = vperm.xlu1 %2309, %v2679_v4   ;;  %1210 = vperm.xlu0 %2324, %v2679_v4  }
  0xa8   : > { %2311 = vset.pattern.permute.xlu1 %v2487_v12  ;;  %2328 = vset.pattern.permute.xlu0 %v2492_v17 }
  0xa9   : > { %894 = vperm.xlu1 %2311, %v2674_v3   ;;  %1284 = vperm.xlu0 %2328, %v2674_v3  }
  0xad   : > { %2312 = vset.pattern.permute.xlu1 %v2486_v11  ;;  %2331 = vset.pattern.permute.xlu0 %v2493_v18 }
  0xae   : > { %824 = vperm.xlu1 %2312, %v2686_v6   ;;  %1358 = vperm.xlu0 %2331, %v2669_v0  }
  0xb2   : > { %2313 = vset.pattern.permute.xlu1 %v2488_v13  ;;  %1366 = vperm.xlu0 %2331, %v2679_v4  }
  0xb3   : > { %968 = vperm.xlu1 %2313, %v2669_v0  }
  0xb6   : > { %2335 = vset.pattern.permute.xlu0 %v2494_v19 }
  0xb7   : > { %2315 = vset.pattern.permute.xlu1 %v2487_v12  ;;  %1440 = vperm.xlu0 %2335, %v2674_v3  }
  0xb8   : > { %902 = vperm.xlu1 %2315, %v2686_v6  }
  0xbb   : > { %1448 = vperm.xlu0 %2335, %v2686_v6  }
  0xbc   : > { %2316 = vset.pattern.permute.xlu1 %v2488_v13 }
  0xbd   : > { %976 = vperm.xlu1 %2316, %v2679_v4  }
  0xc1   : > { %2318 = vset.pattern.permute.xlu1 %v2489_v14 }
  0xc2   : > { %1050 = vperm.xlu1 %2318, %v2674_v3  }
  0xc6   : > { %2319 = vset.pattern.permute.xlu1 %v2488_v13 }
  0xc7   : > { %980 = vperm.xlu1 %2319, %v2686_v6  }
  0xcb   : > { %2320 = vset.pattern.permute.xlu1 %v2490_v15  ;;  %v345_v24 = vpop.permute.xlu1 %344  ;;  %v256_v25 = vpop.permute.xlu0 %255 }
  0xcc   : > { %v362_v26 = vrot.slane %v345_v24, %v2738_v23  ;;  %v278_v27 = vrot.slane %v256_v25, %v2738_v23  ;;  %1124 = vperm.xlu1 %2320, %v2669_v0  }
  0xce   : > { %v403_v28 = vsub.f32 %v345_v24, %v362_v26  ;;  %v325_v29 = vsub.f32 %v256_v25, %v278_v27 }
  0xcf   : > { %v349_v32 = vpop.permute.xlu1 %348  ;;  %v261_v33 = vpop.permute.xlu0 %260 }
  0xd0   : > { %v408_v34 = vand.u32 2147483647, %v403_v28  ;;  %v330_v35 = vand.u32 2147483647, %v325_v29  ;;  %v366_v36 = vrot.slane %v349_v32, %v2738_v23  ;;  %v282_v37 = vrot.slane %v261_v33, %v2738_v23  ;;  %2322 = vset.pattern.permute.xlu1 %v2489_v14 }
  0xd1   : > { %1058 = vperm.xlu1 %2322, %v2686_v6  }
  0xd2   : > { %v413_v38 = vmul.f32 %v412_v30, %v408_v34  ;;  %v335_v39 = vmul.f32 %v334_v31, %v330_v35  ;;  %v404_v40 = vsub.f32 %v349_v32, %v366_v36  ;;  %v326_v41 = vsub.f32 %v261_v33, %v282_v37 }
  0xd3   : > { %v353_v42 = vpop.permute.xlu1 %352  ;;  %v266_v43 = vpop.permute.xlu0 %265 }
  0xd4   : > { %v417_v44 = vadd.f32 %v413_v38, %v335_v39  ;;  %v370_v45 = vrot.slane %v353_v42, %v2738_v23  ;;  %v286_v46 = vrot.slane %v266_v43, %v2738_v23  ;;  %v409_v47 = vand.u32 2147483647, %v404_v40 }
  0xd5   : > { %2323 = vset.pattern.permute.xlu1 %v2490_v15  ;;  %v331_v49 = vand.u32 2147483647, %v326_v41  ;;  %v568_v40 = vstv %s2146_s20 }
  0xd6   : > { %v405_v48 = vsub.f32 %v353_v42, %v370_v45  ;;  %1132 = vperm.xlu1 %2323, %v2679_v4   ;;  %v327_v50 = vsub.f32 %v266_v43, %v286_v46  ;;  %v414_v57 = vmul.f32 %v412_v30, %v409_v47 }
  0xd7   : > { %v336_v59 = vmul.f32 %v334_v31, %v331_v49 }
  0xd8   : > { %v410_v51 = vand.u32 2147483647, %v405_v48  ;;  %v427_v52 = vpop.permute.xlu1 %426  ;;  %v423_v53 = vpop.permute.xlu0 %422  ;;  %v332_v54 = vand.u32 2147483647, %v327_v50 }
  0xd9   : > { %v444_v55 = vrot.slane %v427_v52, %v2738_v23  ;;  %v440_v56 = vrot.slane %v423_v53, %v2738_v23  ;;  %v418_v11 = vadd.f32 %v414_v57, %v336_v59 }
  0xda   : > { %v415_v58 = vmul.f32 %v412_v30, %v410_v51  ;;  %2325 = vset.pattern.permute.xlu1 %v2491_v16  ;;  %v337_v60 = vmul.f32 %v334_v31, %v332_v54 }
  0xdb   : > { %v482_v61 = vsub.f32 %v427_v52, %v444_v55  ;;  %v481_v62 = vsub.f32 %v423_v53, %v440_v56  ;;  %1206 = vperm.xlu1 %2325, %v2674_v3  }
  0xdc   : > { %v419_v1 = vadd.f32 %v415_v58, %v337_v60 }
  0xdd   : > { %v487_v2 = vand.u32 2147483647, %v482_v61  ;;  %v486_v5 = vand.u32 2147483647, %v481_v62  ;;  %v271_v7 = vpop.permute.xlu1 %270  ;;  %v357_v8 = vpop.permute.xlu0 %356 }
  0xde   : > { %v290_v9 = vrot.slane %v271_v7, %v2738_v23  ;;  %v374_v10 = vrot.slane %v357_v8, %v2738_v23 }
  0xdf   : > { %v492_v12 = vmul.f32 %v490_v63, %v487_v2  ;;  %v491_v13 = vmul.f32 %v490_v63, %v486_v5  ;;  %2326 = vset.pattern.permute.xlu1 %v2490_v15  ;;  %v646_v2 = vstv %s2147_s25 }
  0xe0   : > { %v328_v14 = vsub.f32 %v271_v7, %v290_v9  ;;  %v406_v20 = vsub.f32 %v357_v8, %v374_v10  ;;  %1136 = vperm.xlu1 %2326, %v2686_v6  }
  0xe1   : > { %v496_v21 = vadd.f32 %v492_v12, %v418_v11  ;;  %v495_v22 = vadd.f32 %v491_v13, %v417_v44 }
  0xe2   : > { %v333_v24 = vand.u32 2147483647, %v328_v14  ;;  %v411_v25 = vand.u32 2147483647, %v406_v20  ;;  %v431_v26 = vpop.permute.xlu1 %430  ;;  %v505_v37 = vpop.permute.xlu0 %504 }
  0xe3   : > { %v448_v27 = vrot.slane %v431_v26, %v2738_v23  ;;  %v522_v41 = vrot.slane %v505_v37, %v2738_v23 }
  0xe4   : > { %v338_v28 = vmul.f32 %v334_v31, %v333_v24  ;;  %v416_v29 = vmul.f32 %v412_v30, %v411_v25  ;;  %2327 = vset.pattern.permute.xlu1 %v2492_v17 }
  0xe5   : > { %v483_v32 = vsub.f32 %v431_v26, %v448_v27  ;;  %1280 = vperm.xlu1 %2327, %v2669_v0  }
  0xe6   : > { %v420_v15 = vadd.f32 %v416_v29, %v338_v28 }
  0xe7   : > { %v488_v33 = vand.u32 2147483647, %v483_v32  ;;  %v501_v34 = vpop.permute.xlu1 %500  ;;  %v579_v50 = vpop.permute.xlu0 %578  ;;  %v724_v32 = vstv %s2148_s30 }
  0xe8   : > { %v518_v35 = vrot.slane %v501_v34, %v2738_v23  ;;  %v596_v56 = vrot.slane %v579_v50, %v2738_v23 }
  0xe9   : > { %v493_v36 = vmul.f32 %v490_v63, %v488_v33  ;;  %2329 = vset.pattern.permute.xlu1 %v2491_v16  ;;  %v560_v16 = vsub.f32 %v505_v37, %v522_v41 }
  0xea   : > { %v559_v38 = vsub.f32 %v501_v34, %v518_v35  ;;  %1214 = vperm.xlu1 %2329, %v2686_v6   ;;  %v637_v62 = vsub.f32 %v579_v50, %v596_v56  ;;  %v2495_v56 = vmov 0.0  }
  0xeb   : > { %v497_v31 = vadd.f32 %v493_v36, %v419_v1  ;;  %v565_v52 = vand.u32 2147483647, %v560_v16  ;;  %v587_v8 = vpop.permute.xlu0 %586  ;;  %2187 = vmatprep.subr.mxu1 %v2495_v56  ;;  %2182 = vmatprep.subr.mxu0 %v2495_v56 }
  0xec   : > { %v564_v30 = vand.u32 2147483647, %v559_v38  ;;  %v435_v39 = vpop.permute.xlu1 %434  ;;  %v604_v14 = vrot.slane %v587_v8, %v2738_v23  ;;  %2188 = vmatpush3.xpose.msk.msra.mxu1 %vm1513_vm0, %v2674_v3  ;;  %2189 = vmatprep.mubr.msk.f32.mxu1 %vm2496_vm1, %v2495_v56 }
  0xed   : > { %v452_v42 = vrot.slane %v435_v39, %v2738_v23  ;;  %v570_v59 = vmul.f32 %v568_v40, %v565_v52  ;;  %2183 = vmatpush3.xpose.msk.msra.mxu0 %vm1513_vm0, %v2669_v0  ;;  %2184 = vmatprep.mubr.msk.f32.mxu0 %vm2496_vm1, %v2495_v56 }
  0xee   : > { %v569_v43 = vmul.f32 %v568_v40, %v564_v30  ;;  %2330 = vset.pattern.permute.xlu1 %v2492_v17  ;;  %v639_v27 = vsub.f32 %v587_v8, %v604_v14  ;;  %2197 = vmatprep.subr.mxu1 %v2495_v56 }
  0xef   : > { %v484_v44 = vsub.f32 %v435_v39, %v452_v42  ;;  %1288 = vperm.xlu1 %2330, %v2679_v4   ;;  %v574_v7 = vadd.f32 %v570_v59, %v496_v21  ;;  %2192 = vmatprep.subr.mxu0 %v2495_v56 }
  0xf0   : > { %v573_v45 = vadd.f32 %v569_v43, %v495_v22  ;;  %v661_v24 = vpop.permute.xlu0 %660  ;;  %2190 = vmatmul.mubr.msk.f32.vlgmr.msra.gmra.mrb[0].mxu1 %vm1513_vm0, %v2674_v3  ;;  %2185 = vmatmul.mubr.msk.f32.vlgmr.msra.gmra.mrb[0].mxu0 %vm1513_vm0, %v2669_v0 }
  0xf1   : > { %v489_v46 = vand.u32 2147483647, %v484_v44  ;;  %v509_v47 = vpop.permute.xlu1 %508  ;;  %2198 = vmatpush3.xpose.msk.msra.mxu1 %vm1513_vm0, %v2686_v6  ;;  %2193 = vmatpush3.xpose.msk.msra.mxu0 %vm1513_vm0, %v2679_v4 }
  0xf2   : > { %v526_v48 = vrot.slane %v509_v47, %v2738_v23  ;;  %2199 = vmatprep.mubr.msk.f32.mxu1 %vm2496_vm1, %v2495_v56  ;;  %2194 = vmatprep.mubr.msk.f32.mxu0 %vm2496_vm1, %v2495_v56 }
  0xf3   : > { %v494_v49 = vmul.f32 %v490_v63, %v489_v46  ;;  %2332 = vset.pattern.permute.xlu1 %v2493_v18 }
  0xf4   : > { %v561_v51 = vsub.f32 %v509_v47, %v526_v48  ;;  %1362 = vperm.xlu1 %2332, %v2674_v3   ;;  %2200 = vmatmul.mubr.msk.f32.vlgmr.msra.gmra.mrb[2].mxu1 %vm1513_vm0, %v2686_v6 }
  0xf5   : > { %v498_v53 = vadd.f32 %v494_v49, %v420_v15  ;;  %v678_v15 = vrot.slane %v661_v24, %v2738_v23  ;;  %v735_v42 = vpop.permute.xlu0 %734  ;;  %2195 = vmatmul.mubr.msk.f32.vlgmr.msra.gmra.mrb[2].mxu0 %vm1513_vm0, %v2679_v4 }
  0xf6   : > { %v566_v54 = vand.u32 2147483647, %v561_v51  ;;  %v583_v55 = vpop.permute.xlu1 %582  ;;  %v752_v46 = vrot.slane %v735_v42, %v2738_v23 }
  0xf7   : > { %v600_v57 = vrot.slane %v583_v55, %v2738_v23  ;;  %v716_v38 = vsub.f32 %v661_v24, %v678_v15 }
  0xf8   : > { %v571_v58 = vmul.f32 %v568_v40, %v566_v54  ;;  %2333 = vset.pattern.permute.xlu1 %v2492_v17  ;;  %v642_v17 = vand.u32 2147483647, %v637_v62 }
  0xf9   : > { %v638_v60 = vsub.f32 %v583_v55, %v600_v57  ;;  %1292 = vperm.xlu1 %2333, %v2686_v6   ;;  %v721_v44 = vand.u32 2147483647, %v716_v38  ;;  %v802_v57 = vstv %s2149_s12  ;;  %s1985_s12 = scalar_lea.sflag [#allocation4], %s2652_s6 }
  0xfa   : > { %v575_v61 = vadd.f32 %v571_v58, %v497_v31  ;;  %v647_v21 = vmul.f32 %v646_v2, %v642_v17 }
  0xfb   : > { %v643_v63 = vand.u32 2147483647, %v638_v60  ;;  %v513_v1 = vpop.permute.xlu1 %512  ;;  %v726_v50 = vmul.f32 %v724_v32, %v721_v44 }
  0xfc   : > { %v530_v5 = vrot.slane %v513_v1, %v2738_v23  ;;  %v651_v34 = vadd.f32 %v647_v21, %v573_v45 }
  0xfd   : > { %v648_v9 = vmul.f32 %v646_v2, %v643_v63  ;;  %2334 = vset.pattern.permute.xlu1 %v2494_v19 }
  0xfe   : > { %v562_v10 = vsub.f32 %v513_v1, %v530_v5  ;;  %1436 = vperm.xlu1 %2334, %v2669_v0  }
  0xff   : > { %v652_v11 = vadd.f32 %v648_v9, %v574_v7 }
 0x100   : > { %v567_v12 = vand.u32 2147483647, %v562_v10  ;;  %v657_v13 = vpop.permute.xlu1 %656 }
 0x101   : > { %v674_v20 = vrot.slane %v657_v13, %v2738_v23  ;;  %v730_v59 = vadd.f32 %v726_v50, %v652_v11 }
 0x102   : > { %v572_v22 = vmul.f32 %v568_v40, %v567_v12  ;;  %2336 = vset.pattern.permute.xlu1 %v2493_v18  ;;  %v644_v18 = vand.u32 2147483647, %v639_v27 }
 0x103   : > { %v715_v25 = vsub.f32 %v657_v13, %v674_v20  ;;  %1370 = vperm.xlu1 %2336, %v2686_v6   ;;  %v2818_v13 = vstv %s2150_s8 }
 0x104   : > { %v576_v26 = vadd.f32 %v572_v22, %v498_v53  ;;  %v649_v41 = vmul.f32 %v646_v2, %v644_v18  ;;  %v793_v53 = vsub.f32 %v735_v42, %v752_v46 }
 0x105   : > { %v720_v28 = vand.u32 2147483647, %v715_v25  ;;  %v591_v29 = vpop.permute.xlu1 %590 }
 0x106   : > { %v608_v33 = vrot.slane %v591_v29, %v2738_v23  ;;  %v653_v48 = vadd.f32 %v649_v41, %v575_v61  ;;  %v743_v61 = vpop.permute.xlu0 %742  ;;  %v798_v63 = vand.u32 2147483647, %v793_v53 }
 0x107   : > { %v725_v35 = vmul.f32 %v724_v32, %v720_v28  ;;  %2337 = vset.pattern.permute.xlu1 %v2494_v19  ;;  %v760_v7 = vrot.slane %v743_v61, %v2738_v23 }
 0x108   : > { %v640_v36 = vsub.f32 %v591_v29, %v608_v33  ;;  %1444 = vperm.xlu1 %2337, %v2679_v4   ;;  %v803_v3 = vmul.f32 %v802_v57, %v798_v63 }
 0x109   : > { %v2788_v37 = vadd.f32 %v725_v35, %v651_v34  ;;  %v795_v17 = vsub.f32 %v743_v61, %v760_v7 }
 0x10a   : > { %v645_v31 = vand.u32 2147483647, %v640_v36  ;;  %v665_v30 = vpop.permute.xlu1 %664 }
 0x10b   : > { %v682_v39 = vrot.slane %v665_v30, %v2738_v23  ;;  %v807_v20 = vadd.f32 %v803_v3, %v2788_v37  ;;  %v800_v24 = vand.u32 2147483647, %v795_v17  ;;  %v817_v37 = vpop.permute.xlu0 %816  ;;  %v2869_v3 = vstv %s2153_s22 }
 0x10c   : > { %v650_v40 = vmul.f32 %v646_v2, %v645_v31  ;;  %v834_v50 = vrot.slane %v817_v37, %v2738_v23 }
 0x10d   : > { %v717_v43 = vsub.f32 %v665_v30, %v682_v39  ;;  %v805_v28 = vmul.f32 %v802_v57, %v800_v24 }
 0x10e   : > { %v654_v45 = vadd.f32 %v650_v40, %v576_v26 }
 0x10f   : > { %v722_v16 = vand.u32 2147483647, %v717_v43  ;;  %v739_v19 = vpop.permute.xlu1 %738  ;;  %v891_v31 = vpop.permute.xlu0 %890 }
 0x110   : > { %v756_v47 = vrot.slane %v739_v19, %v2738_v23 }
 0x111   : > { %v727_v49 = vmul.f32 %v724_v32, %v722_v16 }
 0x112   : > { %v794_v51 = vsub.f32 %v739_v19, %v756_v47 }
 0x113   : > { %v731_v52 = vadd.f32 %v727_v49, %v653_v48  ;;  %v899_v39 = vpop.permute.xlu0 %898 }
 0x114   : > { %v799_v54 = vand.u32 2147483647, %v794_v51  ;;  %v669_v55 = vpop.permute.xlu1 %668  ;;  %v908_v51 = vrot.slane %v891_v31, %v2738_v23  ;;  %v916_v61 = vrot.slane %v899_v39, %v2738_v23 }
 0x115   : > { %v686_v58 = vrot.slane %v669_v55, %v2738_v23  ;;  %v809_v34 = vadd.f32 %v805_v28, %v731_v52 }
 0x116   : > { %v804_v60 = vmul.f32 %v802_v57, %v799_v54 }
 0x117   : > { %v718_v62 = vsub.f32 %v669_v55, %v686_v58  ;;  %v973_v41 = vpop.permute.xlu0 %972  ;;  %v872_v55 = vsub.f32 %v817_v37, %v834_v50 }
 0x118   : > { %v2800_v1 = vadd.f32 %v804_v60, %v730_v59  ;;  %v990_v56 = vrot.slane %v973_v41, %v2738_v23 }
 0x119   : > { %v723_v2 = vand.u32 2147483647, %v718_v62  ;;  %v813_v5 = vpop.permute.xlu1 %812  ;;  %v877_v60 = vand.u32 2147483647, %v872_v55 }
 0x11a   : > { %v830_v8 = vrot.slane %v813_v5, %v2738_v23 }
 0x11b   : > { %v728_v9 = vmul.f32 %v724_v32, %v723_v2  ;;  %v1047_v43 = vpop.permute.xlu0 %1046  ;;  %v2863_v2 = vstv %s2151_s13  ;;  %s2497_s13 = smov [#allocation7]  }
 0x11c   : > { %v871_v10 = vsub.f32 %v813_v5, %v830_v8  ;;  %v1064_v62 = vrot.slane %v1047_v43, %v2738_v23  ;;  %v2867_v8 = vstv %s2152_s14  ;;  %s2407_s14 = sshll.u32 %s2497_s13, 4  ;;  %s2408_s14 = int_to_ptr.vmem [resolvable:$false] %s2407_s14 }
 0x11d   : > { %v732_v0 = vadd.f32 %v728_v9, %v654_v45  ;;  %v1028_v9 = vsub.f32 %v973_v41, %v990_v56  ;;  %s2409_s22 = scalar_lea.vmem %s2408_s14, 1024 }
 0x11e   : > { %v876_v11 = vand.u32 2147483647, %v871_v10  ;;  %v747_v12 = vpop.permute.xlu1 %746  ;;  %v1105_v24 = vsub.f32 %v1047_v43, %v1064_v62 }
 0x11f   : > { %v764_v14 = vrot.slane %v747_v12, %v2738_v23  ;;  %v1055_v44 = vpop.permute.xlu0 %1054 }
 0x120   : > { %v881_v22 = vmul.f32 %v2818_v13, %v876_v11  ;;  %v1072_v5 = vrot.slane %v1055_v44, %v2738_v23  ;;  %v2872_v11 = vstv %s2154_s23 }
 0x121   : > { %v796_v21 = vsub.f32 %v747_v12, %v764_v14  ;;  %v2874_v12 = vstv %s2155_s5 }
 0x122   : > { %v2823_v25 = vadd.f32 %v881_v22, %v807_v20  ;;  %v882_v20 = vmul.f32 %v2818_v13, %v877_v60  ;;  %v951_v22 = vsub.f32 %v899_v39, %v916_v61  ;;  %v2894_v39 = vstv %s2857_s29 }
 0x123   : > { %v801_v6 = vand.u32 2147483647, %v796_v21  ;;  %v821_v26 = vpop.permute.xlu1 %820  ;;  %v1129_v19 = vpop.permute.xlu0 %1128 }
 0x124   : > { %v838_v27 = vrot.slane %v821_v26, %v2738_v23  ;;  %v1146_v10 = vrot.slane %v1129_v19, %v2738_v23  ;;  %v886_v41 = vadd.f32 %v882_v20, %v2800_v1 }
 0x125   : > { %v806_v4 = vmul.f32 %v802_v57, %v801_v6  ;;  %v949_v57 = vsub.f32 %v891_v31, %v908_v51  ;;  %v1107_v6 = vsub.f32 %v1055_v44, %v1072_v5  ;;  %v1110_v44 = vand.u32 2147483647, %v1105_v24 }
 0x126   : > { %v873_v29 = vsub.f32 %v821_v26, %v838_v27 }
 0x127   : > { %v2826_v32 = vadd.f32 %v806_v4, %v732_v0  ;;  %v1203_v46 = vpop.permute.xlu0 %1202  ;;  %v954_v0 = vand.u32 2147483647, %v949_v57  ;;  %v2882_v4 = vstv %s2156_s10  ;;  %v1112_v50 = vand.u32 2147483647, %v1107_v6 }
 0x128   : > { %v878_v15 = vand.u32 2147483647, %v873_v29  ;;  %v895_v33 = vpop.permute.xlu1 %894  ;;  %v1220_v27 = vrot.slane %v1203_v46, %v2738_v23  ;;  %v1033_v29 = vand.u32 2147483647, %v1028_v9  ;;  %v1115_v9 = vmul.f32 %v2869_v3, %v1110_v44 }
 0x129   : > { %v912_v52 = vrot.slane %v895_v33, %v2738_v23 }
 0x12a   : > { %v883_v35 = vmul.f32 %v2818_v13, %v878_v15  ;;  %v1184_v15 = vsub.f32 %v1129_v19, %v1146_v10  ;;  %v1261_v51 = vsub.f32 %v1203_v46, %v1220_v27  ;;  %v1038_v56 = vmul.f32 %v2867_v8, %v1033_v29 }
 0x12b   : > { %v2845_v48 = vpop.permute.xlu0 %1210  ;;  %v950_v58 = vsub.f32 %v895_v33, %v912_v52 }
 0x12c   : > { %v2829_v36 = vadd.f32 %v883_v35, %v809_v34  ;;  %v2888_v34 = vstv %s2853_s26  ;;  %v959_v35 = vmul.f32 %v2863_v2, %v954_v0  ;;  %v1228_v52 = vrot.slane %v2845_v48, %v2738_v23 }
 0x12d   : > { %v2831_v18 = vpop.permute.xlu1 %824  ;;  %v955_v17 = vand.u32 2147483647, %v950_v58  ;;  %v1189_v58 = vand.u32 2147483647, %v1184_v15  ;;  %v2913_v0 = vmul.f32 %v2869_v3, %v1112_v50 }
 0x12e   : > { %v842_v57 = vrot.slane %v2831_v18, %v2738_v23  ;;  %v2917_v20 = vsub.f32 %v2845_v48, %v1228_v52 }
 0x12f   : > { %v1285_v54 = vpop.permute.xlu0 %1284  ;;  %v960_v37 = vmul.f32 %v2863_v2, %v955_v17  ;;  %v1266_v17 = vand.u32 2147483647, %v1261_v51 }
 0x130   : > { %v1302_v33 = vrot.slane %v1285_v54, %v2738_v23 }
 0x131   : > { %v964_v1 = vadd.f32 %v960_v37, %v886_v41  ;;  %v1271_v41 = vmul.f32 %v2874_v12, %v1266_v17 }
 0x132   : > { %v2833_v38 = vpop.permute.xlu1 %968  ;;  %v1340_v60 = vsub.f32 %v1285_v54, %v1302_v33  ;;  %v963_v33 = vadd.f32 %v959_v35, %v2823_v25 }
 0x133   : > { %v2855_v59 = vpop.permute.xlu0 %1358  ;;  %v986_v21 = vrot.slane %v2833_v38, %v2738_v23  ;;  %v1042_v6 = vadd.f32 %v1038_v56, %v964_v1 }
 0x134   : > { %v1376_v46 = vrot.slane %v2855_v59, %v2738_v23  ;;  %v1345_v24 = vand.u32 2147483647, %v1340_v60 }
 0x135   : > { %v1027_v43 = vsub.f32 %v2833_v38, %v986_v21  ;;  %v1194_v21 = vmul.f32 %v2872_v11, %v1189_v58 }
 0x136   : > { %v1417_v29 = vsub.f32 %v2855_v59, %v1376_v46  ;;  %v1350_v35 = vmul.f32 %v2882_v4, %v1345_v24 }
 0x137   : > { %v2835_v30 = vpop.permute.xlu1 %902  ;;  %v2876_v14 = vpop.permute.xlu0 %1366 }
 0x138   : > { %v1422_v51 = vand.u32 2147483647, %v1417_v29 }
 0x13b   : > { %v1441_v55 = vpop.permute.xlu0 %1440 }
 0x13c   : > { %v2837_v40 = vpop.permute.xlu1 %976  ;;  %v1458_v10 = vrot.slane %v1441_v55, %v2738_v23 }
 0x13e   : > { %v1496_v37 = vsub.f32 %v1441_v55, %v1458_v10 }
 0x141   : > { %v1051_v42 = vpop.permute.xlu1 %1050 }
 0x142   : > { %v1068_v7 = vrot.slane %v1051_v42, %v2738_v23 }
 0x144   : > { %v1106_v26 = vsub.f32 %v1051_v42, %v1068_v7  ;;  %v956_v42 = vand.u32 2147483647, %v951_v22  ;;  %v1032_v7 = vand.u32 2147483647, %v1027_v43  ;;  %v994_v22 = vrot.slane %v2837_v40, %v2738_v23 }
 0x146   : > { %v2839_v45 = vpop.permute.xlu1 %980  ;;  %v1111_v19 = vand.u32 2147483647, %v1106_v26  ;;  %v961_v5 = vmul.f32 %v2863_v2, %v956_v42  ;;  %v1037_v48 = vmul.f32 %v2867_v8, %v1032_v7  ;;  %v1268_v42 = vand.u32 2147483647, %v2917_v20 }
 0x147   : > { %v1029_v43 = vsub.f32 %v2837_v40, %v994_v22  ;;  %v998_v25 = vrot.slane %v2839_v45, %v2738_v23 }
 0x148   : > { %v1116_v54 = vmul.f32 %v2869_v3, %v1111_v19  ;;  %v965_v59 = vadd.f32 %v961_v5, %v2829_v36  ;;  %v1041_v52 = vadd.f32 %v1037_v48, %v963_v33  ;;  %v1501_v36 = vand.u32 2147483647, %v1496_v37 }
 0x14a   : > { %v1119_v17 = vadd.f32 %v1115_v9, %v1041_v52 }
 0x14b   : > { %v2841_v16 = vpop.permute.xlu1 %1124 }
 0x14c   : > { %v1142_v38 = vrot.slane %v2841_v16, %v2738_v23 }
 0x14e   : > { %v1183_v26 = vsub.f32 %v2841_v16, %v1142_v38  ;;  %v1034_v38 = vand.u32 2147483647, %v1029_v43 }
 0x150   : > { %v2843_v47 = vpop.permute.xlu1 %1058  ;;  %v1188_v50 = vand.u32 2147483647, %v1183_v26 }
 0x151   : > { %v1076_v56 = vrot.slane %v2843_v47, %v2738_v23 }
 0x152   : > { %v1193_v7 = vmul.f32 %v2872_v11, %v1188_v50  ;;  %v1449_v50 = vpop.permute.xlu0 %1448 }
 0x154   : > { %v1197_v33 = vadd.f32 %v1193_v7, %v1119_v17 }
 0x155   : > { %v2847_v49 = vpop.permute.xlu1 %1132 }
 0x156   : > { %v1150_v40 = vrot.slane %v2847_v49, %v2738_v23 }
 0x158   : > { %v1185_v22 = vsub.f32 %v2847_v49, %v1150_v40  ;;  %v1466_v40 = vrot.slane %v1449_v50, %v2738_v23 }
 0x15a   : > { %v1207_v53 = vpop.permute.xlu1 %1206  ;;  %v1498_v17 = vsub.f32 %v1449_v50, %v1466_v40 }
 0x15b   : > { %v1224_v31 = vrot.slane %v1207_v53, %v2738_v23 }
 0x15d   : > { %v1262_v62 = vsub.f32 %v1207_v53, %v1224_v31  ;;  %v874_v53 = vsub.f32 %v2831_v18, %v842_v57  ;;  %v920_v18 = vrot.slane %v2835_v30, %v2738_v23  ;;  %v1120_v31 = vadd.f32 %v1116_v54, %v1042_v6 }
 0x15e   : > { %v1506_v6 = vmul.f32 %v2894_v39, %v1501_v36 }
 0x15f   : > { %v2861_v63 = vpop.permute.xlu1 %1136  ;;  %v1267_v27 = vand.u32 2147483647, %v1262_v62  ;;  %v879_v44 = vand.u32 2147483647, %v874_v53  ;;  %v952_v55 = vsub.f32 %v2835_v30, %v920_v18  ;;  %v1198_v58 = vadd.f32 %v1194_v21, %v1120_v31 }
 0x160   : > { %v1030_v62 = vsub.f32 %v2839_v45, %v998_v25  ;;  %v1154_v46 = vrot.slane %v2861_v63, %v2738_v23  ;;  %v1384_v30 = vrot.slane %v2876_v14, %v2738_v23  ;;  %v1108_v53 = vsub.f32 %v2843_v47, %v1076_v56 }
 0x161   : > { %v1272_v19 = vmul.f32 %v2874_v12, %v1267_v27  ;;  %v884_v5 = vmul.f32 %v2818_v13, %v879_v44  ;;  %v1039_v13 = vmul.f32 %v2867_v8, %v1034_v38  ;;  %v1427_v31 = vmul.f32 %v2888_v34, %v1422_v51 }
 0x162   : > { %v1035_v27 = vand.u32 2147483647, %v1030_v62  ;;  %v1186_v29 = vsub.f32 %v2861_v63, %v1154_v46  ;;  %v1113_v37 = vand.u32 2147483647, %v1108_v53  ;;  %v1190_v25 = vand.u32 2147483647, %v1185_v22 }
 0x163   : > { %v1276_v10 = vadd.f32 %v1272_v19, %v1198_v58  ;;  %v888_v43 = vadd.f32 %v884_v5, %v2826_v32  ;;  %v1419_v5 = vsub.f32 %v2876_v14, %v1384_v30 }
 0x164   : > { %v2884_v28 = vpop.permute.xlu1 %1280  ;;  %v1040_v19 = vmul.f32 %v2867_v8, %v1035_v27  ;;  %v1191_v52 = vand.u32 2147483647, %v1186_v29  ;;  %v1118_v32 = vmul.f32 %v2869_v3, %v1113_v37 }
 0x165   : > { %v1298_v16 = vrot.slane %v2884_v28, %v2738_v23  ;;  %v1354_v48 = vadd.f32 %v1350_v35, %v1276_v10  ;;  %v1043_v35 = vadd.f32 %v1039_v13, %v965_v59  ;;  %v1503_v13 = vand.u32 2147483647, %v1498_v17 }
 0x167   : > { %v1339_v60 = vsub.f32 %v2884_v28, %v1298_v16  ;;  %v957_v28 = vand.u32 2147483647, %v952_v55 }
 0x169   : > { %v2903_v61 = vpop.permute.xlu1 %1214  ;;  %v1344_v21 = vand.u32 2147483647, %v1339_v60  ;;  %v962_v49 = vmul.f32 %v2863_v2, %v957_v28  ;;  %v1195_v60 = vmul.f32 %v2872_v11, %v1190_v25 }
 0x16a   : > { %v1232_v45 = vrot.slane %v2903_v61, %v2738_v23 }
 0x16b   : > { %v1349_v63 = vmul.f32 %v2882_v4, %v1344_v21 }
 0x16c   : > { %v1264_v16 = vsub.f32 %v2903_v61, %v1232_v45  ;;  %v966_v61 = vadd.f32 %v962_v49, %v888_v43 }
 0x16e   : > { %v2925_v15 = vpop.permute.xlu1 %1288  ;;  %v1269_v58 = vand.u32 2147483647, %v1264_v16  ;;  %v1044_v38 = vadd.f32 %v1040_v19, %v966_v61 }
 0x16f   : > { %v1306_v47 = vrot.slane %v2925_v15, %v2738_v23 }
 0x170   : > { %v1122_v10 = vadd.f32 %v1118_v32, %v1044_v38  ;;  %v2355_v38 = vld [vmem:[%s2658_s11] sm:$0xff] }
 0x171   : > { %v1341_v2 = vsub.f32 %v2925_v15, %v1306_v47  ;;  %v1121_v15 = vadd.f32 %v2913_v0, %v1043_v35 }
 0x173   : > { %v1363_v57 = vpop.permute.xlu1 %1362  ;;  %v1346_v46 = vand.u32 2147483647, %v1341_v2  ;;  %v1199_v53 = vadd.f32 %v1195_v60, %v1121_v15  ;;  %v2354_v60 = vld [vmem:[%s2658_s11 + $0x8] sm:$0xff] }
 0x174   : > { %v1380_v1 = vrot.slane %v1363_v57, %v2738_v23 }
 0x175   : > { %v1351_v30 = vmul.f32 %v2882_v4, %v1346_v46  ;;  %v2356_v46 = vld [vmem:[%s2658_s11 + $0x18] sm:$0xff] }
 0x176   : > { %v1418_v54 = vsub.f32 %v1363_v57, %v1380_v1  ;;  %v1275_v57 = vadd.f32 %v1271_v41, %v1197_v33  ;;  %v1196_v41 = vmul.f32 %v2872_v11, %v1191_v52  ;;  %v1273_v11 = vmul.f32 %v2874_v12, %v1268_v42 }
 0x178   : > { %v1423_v24 = vand.u32 2147483647, %v1418_v54  ;;  %v1293_v26 = vpop.permute.xlu1 %1292  ;;  %v1353_v59 = vadd.f32 %v1349_v63, %v1275_v57  ;;  %v1274_v54 = vmul.f32 %v2874_v12, %v1269_v58  ;;  %v1200_v0 = vadd.f32 %v1196_v41, %v1122_v10  ;;  %v2357_v10 = vld [vmem:[%s2658_s11 + $0x10] sm:$0xff]  ;;  %s3020_s11 = scalar_lea.vmem [#allocation7], %s2141_s7  ;;  %s2173_s7 = sshll.u32 %s2546_s19, 9 }
 0x179   : > { %v1310_v9 = vrot.slane %v1293_v26, %v2738_v23  ;;  %v1802_v41 = vmul.f32 %v2355_v38, %v2355_v38  ;;  %s2004_s9 = sshll.u32 %s3020_s11, 4  ;;  %s3050_s30 = scalar_lea.hbm %s3106_s2, %s2173_s7  ;;  %s3052_s9 = int_to_ptr.vmem [resolvable:$true] %s2004_s9 }
 0x17a   : > { %v1428_v18 = vmul.f32 %v2888_v34, %v1423_v24  ;;  %v1431_v22 = vadd.f32 %v1427_v31, %v1353_v59  ;;  %v1424_v24 = vand.u32 2147483647, %v1419_v5  ;;  %v1803_v59 = vmul.f32 %v2354_v60, %v2354_v60  ;;  %s2403_s8 = scalar_lea.vmem %s3052_s9, 512  ;;  %p2410_p10 = scmp.lt.s32.totalorder %s3052_s9, %s2408_s14 }
 0x17b   : > { %v1342_v55 = vsub.f32 %v1293_v26, %v1310_v9  ;;  %v1278_v26 = vadd.f32 %v1274_v54, %v1200_v0  ;;  %v1277_v9 = vadd.f32 %v1273_v11, %v1199_v53  ;;  %v1805_v5 = vmul.f32 %v2356_v46, %v2356_v46  ;;  %p2404_p5 = scmp.ne.s32.totalorder %s3052_s9, %s2403_s8  ;;  %p2411_p1 = scmp.lt.s32.totalorder %s2409_s22, %s2403_s8 }
 0x17c   : > { %v1432_v44 = vadd.f32 %v1428_v18, %v1354_v48  ;;  %v1429_v47 = vmul.f32 %v2888_v34, %v1424_v24  ;;  %v1809_v15 = vsel %vm1513_vm0, %v1803_v59, 0.0  ;;  %v1804_v54 = vmul.f32 %v2357_v10, %v2357_v10 }
 0x17d   : > { %v1437_v56 = vpop.permute.xlu1 %1436  ;;  %v1347_v62 = vand.u32 2147483647, %v1342_v55  ;;  %v1355_v48 = vadd.f32 %v1351_v30, %v1277_v9  ;;  %v1815_v17 = vsel %vm1513_vm0, %v1805_v5, 0.0  ;;  %p2405_p8 = pnand %p2404_p5, %p3122_p12  ;;  %p2412_p4 = por %p2411_p1, %p2410_p10 }
 0x17e   : > { %v1454_v51 = vrot.slane %v1437_v56, %v2738_v23  ;;  %v1510_v36 = vadd.f32 %v1506_v6, %v1432_v44 }
 0x17f   : > { %v1352_v21 = vmul.f32 %v2882_v4, %v1347_v62  ;;  %v1508_v4 = vmul.f32 %v2894_v39, %v1503_v13  ;;  %v1433_v43 = vadd.f32 %v1429_v47, %v1355_v48  ;;  %p2406_p9 = pneg %p2405_p8 }
 0x180   : > { %v1495_v1 = vsub.f32 %v1437_v56, %v1454_v51  ;;  %v1882_v8 = vsel %vm1878_vm2, %v1510_v36, -inf }
 0x181   : > { %1883 = vmax.xlane.f32.xlu0 %v1882_v8  ;;  %v1356_v42 = vadd.f32 %v1352_v21, %v1278_v26  ;;  %p2413_p11 = pnand %p2412_p4, %p2406_p9 }
 0x182   : > { %v1500_v3 = vand.u32 2147483647, %v1495_v1  ;;  %v1371_v7 = vpop.permute.xlu1 %1370 }
 0x183   : > { %v1388_v28 = vrot.slane %v1371_v7, %v2738_v23 }
 0x184   : > { %v1505_v45 = vmul.f32 %v2894_v39, %v1500_v3 }
 0x185   : > { %v1420_v14 = vsub.f32 %v1371_v7, %v1388_v28  ;;  %v1806_v7 = vsel %vm1513_vm0, %v1802_v41, 0.0  ;;  %v1812_v28 = vsel %vm1513_vm0, %v1804_v54, 0.0 }
 0x186   : > { %v1509_v6 = vadd.f32 %v1505_v45, %v1431_v22 }
 0x187   : > { %v1425_v27 = vand.u32 2147483647, %v1420_v14  ;;  %v1445_v29 = vpop.permute.xlu1 %1444 }
 0x188   : > { %v1462_v20 = vrot.slane %v1445_v29, %v2738_v23  ;;  %v1879_v12 = vsel %vm1878_vm2, %v1509_v6, -inf }
 0x189   : > { %v1430_v33 = vmul.f32 %v2888_v34, %v1425_v27  ;;  %1880 = vmax.xlane.f32.xlu1 %v1879_v12 }
 0x18a   : > { %v1497_v18 = vsub.f32 %v1445_v29, %v1462_v20 }
 0x18b   : > { %v1434_v49 = vadd.f32 %v1430_v33, %v1356_v42 }
 0x18c   : > { %v1502_v37 = vand.u32 2147483647, %v1497_v18 }
 0x18d   : > { %v1512_v31 = vadd.f32 %v1508_v4, %v1434_v49 }
 0x18e   : > { %v1507_v16 = vmul.f32 %v2894_v39, %v1502_v37 }
 0x18f   : > { %v1888_v25 = vsel %vm1878_vm2, %v1512_v31, -inf }
 0x190   : > { %1889 = vmax.xlane.f32.xlu1 %v1888_v25  ;;  %v1511_v63 = vadd.f32 %v1507_v16, %v1433_v43 }
 0x192   : > { %v1885_v44 = vsel %vm1878_vm2, %v1511_v63, -inf }
 0x193   : > { %1886 = vmax.xlane.f32.xlu0 %v1885_v44 }
 0x1c3   : > { %v1654_v53 = vpop.f32.mrb[0].mxu1  ;;  %v1582_v45 = vpop.f32.mrb[0].mxu0 }
 0x1c4   : > { %v2191_v11 = vpop.f32.mrb[1].mxu1  ;;  %v2186_v22 = vpop.f32.mrb[1].mxu0  ;;  %v1871_v18 = vmul.f32 2.0, %v1654_v53  ;;  %v1870_v16 = vmul.f32 2.0, %v1582_v45 }
 0x1c7   : > { %v1798_v0 = vpop.f32.mrb[2].mxu1 }
 0x1c8   : > { %v1726_v21 = vpop.f32.mrb[2].mxu0  ;;  %v2201_v14 = vpop.f32.mrb[3].mxu1 }
 0x1c9   : > { %v2196_v30 = vpop.f32.mrb[3].mxu0  ;;  %v1872_v60 = vmul.f32 2.0, %v1726_v21 }
 0x20e   : > { %v1884_v50 = vpop.xlane.xlu0 %1883 }
 0x20f   : > { %v1892_v35 = vsub.f32 %v1510_v36, %v1884_v50 }
 0x211   : > { %v1897_v19 = vmul.f32 1.442695, %v1892_v35 }
 0x213   : > { %2338 = vpow2.f32 %v1897_v19 }
 0x216   : > { %v1881_v34 = vpop.xlane.xlu1 %1880 }
 0x217   : > { %v1891_v52 = vsub.f32 %v1509_v6, %v1881_v34 }
 0x219   : > { %v1895_v55 = vmul.f32 1.442695, %v1891_v52 }
 0x21b   : > { %2340 = vpow2.f32 %v1895_v55 }
 0x21d   : > { %v2339_v56 = vpop.eup %2338  ;;  %v1890_v57 = vpop.xlane.xlu1 %1889 }
 0x21e   : > { %v1894_v39 = vsub.f32 %v1512_v31, %v1890_v57  ;;  %v1906_v2 = vsel %vm1878_vm2, %v2339_v56, 0.0 }
 0x21f   : > { %1907 = vadd.xlane.f32.xlu1 %v1906_v2 }
 0x220   : > { %v1901_v51 = vmul.f32 1.442695, %v1894_v39  ;;  %v1887_v61 = vpop.xlane.xlu0 %1886 }
 0x221   : > { %v1893_v32 = vsub.f32 %v1511_v63, %v1887_v61 }
 0x222   : > { %2342 = vpow2.f32 %v1901_v51 }
 0x223   : > { %v1899_v36 = vmul.f32 1.442695, %v1893_v32 }
 0x225   : > { %v2998_v58 = vpop.eup %2340  ;;  %2344 = vpow2.f32 %v1899_v36  ;;  %v1873_v36 = vmul.f32 2.0, %v1798_v0 }
 0x226   : > { %v1903_v40 = vsel %vm1878_vm2, %v2998_v58, 0.0 }
 0x227   : > { %1904 = vadd.xlane.f32.xlu0 %v1903_v40 }
 0x22c   : > { %v3003_v1 = vpop.eup %2342 }
 0x22d   : > { %v1912_v8 = vsel %vm1878_vm2, %v3003_v1, 0.0 }
 0x22e   : > { %1913 = vadd.xlane.f32.xlu1 %v1912_v8 }
 0x22f   : > { %v3008_v62 = vpop.eup %2344 }
 0x230   : > { %v1909_v3 = vsel %vm1878_vm2, %v3008_v62, 0.0 }
 0x231   : > { %1910 = vadd.xlane.f32.xlu0 %v1909_v3 }
 0x232   : > { %1810 = vadd.xlane.f32.xlu1 %v1809_v15 }
 0x235   : > { %1807 = vadd.xlane.f32.xlu0 %v1806_v7 }
 0x236   : > { %1816 = vadd.xlane.f32.xlu1 %v1815_v17 }
 0x239   : > { %1813 = vadd.xlane.f32.xlu0 %v1812_v28 }
 0x2ac   : > { %v1908_v24 = vpop.xlane.xlu1 %1907 }
 0x2ad   : > { %2346 = vrcp.f32 %v1908_v24 }
 0x2b4   : > { %v1905_v6 = vpop.xlane.xlu0 %1904 }
 0x2b5   : > { %2348 = vrcp.f32 %v1905_v6 }
 0x2b7   : > { %v2347_v26 = vpop.eup %2346 }
 0x2b8   : > { %v1920_v13 = vmul.f32 %v2347_v26, %v1908_v24 }
 0x2ba   : > { %v1924_v27 = vsub.f32 2.0, %v1920_v13 }
 0x2bb   : > { %v1914_v29 = vpop.xlane.xlu1 %1913 }
 0x2bc   : > { %v1928_v9 = vmul.f32 %v2347_v26, %v1924_v27  ;;  %2350 = vrcp.f32 %v1914_v29 }
 0x2be   : > { %v1932_v20 = vmul.f32 %v2339_v56, %v1928_v9  ;;  %v1911_v12 = vpop.xlane.xlu0 %1910 }
 0x2bf   : > { %v2349_v42 = vpop.eup %2348  ;;  %2352 = vrcp.f32 %v1911_v12  ;;  %v1811_v33 = vpop.xlane.xlu1 %1810 }
 0x2c0   : > { %1936 = vst.msk [vmem:[%s3020_s11 + $0x8] sm:$0xff] %vm1878_vm2, %v1932_v20  ;;  %v1919_v48 = vmul.f32 %v2349_v42, %v1905_v6  ;;  %v1829_v47 = vrot.slane %v1811_v33, %v2738_v23  ;;  %v1963_v46 = vmul.f32 %v1932_v20, %v1932_v20 }
 0x2c2   : > { %v1923_v4 = vsub.f32 2.0, %v1919_v48  ;;  %v1867_v49 = vadd.f32 %v1829_v47, %v1811_v33  ;;  %v1808_v37 = vpop.xlane.xlu0 %1807  ;;  %v1967_v17 = vsel %vm1878_vm2, %v1963_v46, 0.0 }
 0x2c3   : > { %v1825_v31 = vrot.slane %v1808_v37, %v2738_v23  ;;  %v1817_v43 = vpop.xlane.xlu1 %1816 }
 0x2c4   : > { %v1927_v25 = vmul.f32 %v2349_v42, %v1923_v4  ;;  %v1875_v63 = vsub.f32 %v1867_v49, %v1871_v18  ;;  %v1837_v19 = vrot.slane %v1817_v43, %v2738_v23 }
 0x2c5   : > { %v1866_v44 = vadd.f32 %v1825_v31, %v1808_v37 }
 0x2c6   : > { %v2351_v50 = vpop.eup %2350  ;;  %v1931_v35 = vmul.f32 %v2998_v58, %v1927_v25  ;;  %v1814_v34 = vpop.xlane.xlu0 %1813  ;;  %v1940_v55 = vmul.f32 %v1932_v20, %v1875_v63  ;;  %v1869_v32 = vadd.f32 %v1837_v19, %v1817_v43 }
 0x2c7   : > { %v1922_v52 = vmul.f32 %v2351_v50, %v1914_v29  ;;  %v1874_v56 = vsub.f32 %v1866_v44, %v1870_v16  ;;  %v1833_v57 = vrot.slane %v1814_v34, %v2738_v23 }
 0x2c8   : > { %1935 = vst.msk [vmem:[%s3020_s11] sm:$0xff] %vm1878_vm2, %v1931_v35  ;;  %v1944_v59 = vsel %vm1878_vm2, %v1940_v55, 0.0  ;;  %v1962_v41 = vmul.f32 %v1931_v35, %v1931_v35  ;;  %v1877_v3 = vsub.f32 %v1869_v32, %v1873_v36 }
 0x2c9   : > { %v2353_v39 = vpop.eup %2352  ;;  %v1926_v2 = vsub.f32 2.0, %v1922_v52  ;;  %v1939_v51 = vmul.f32 %v1931_v35, %v1874_v56  ;;  %v1868_v38 = vadd.f32 %v1833_v57, %v1814_v34 }
 0x2ca   : > { %v1921_v61 = vmul.f32 %v2353_v39, %v1911_v12  ;;  %v1966_v54 = vsel %vm1878_vm2, %v1962_v41, 0.0 }
 0x2cb   : > { %v1930_v40 = vmul.f32 %v2351_v50, %v1926_v2  ;;  %v1943_v58 = vsel %vm1878_vm2, %v1939_v51, 0.0  ;;  %v1876_v10 = vsub.f32 %v1868_v38, %v1872_v60  ;;  %v1968_v45 = vadd.f32 %v1967_v17, %v1966_v54 }
 0x2cc   : > { %v1925_v8 = vsub.f32 2.0, %v1921_v61  ;;  %v1945_v15 = vadd.f32 %v1944_v59, %v1943_v58 }
 0x2cd   : > { %v1934_v23 = vmul.f32 %v3003_v1, %v1930_v40 }
 0x2ce   : > { %v1929_v5 = vmul.f32 %v2353_v39, %v1925_v8 }
 0x2cf   : > { %1938 = vst.msk [vmem:[%s3020_s11 + $0x18] sm:$0xff] %vm1878_vm2, %v1934_v23  ;;  %v1965_v11 = vmul.f32 %v1934_v23, %v1934_v23  ;;  %v1942_v1 = vmul.f32 %v1934_v23, %v1877_v3 }
 0x2d0   : > { %v1933_v7 = vmul.f32 %v3008_v62, %v1929_v5 }
 0x2d1   : > { %v1971_v14 = vsel %vm1878_vm2, %v1965_v11, 0.0  ;;  %v1948_v30 = vsel %vm1878_vm2, %v1942_v1, 0.0 }
 0x2d2   : > { %1937 = vst.msk [vmem:[%s3020_s11 + $0x10] sm:$0xff] %vm1878_vm2, %v1933_v7  ;;  %v1941_v28 = vmul.f32 %v1933_v7, %v1876_v10  ;;  %v1964_v53 = vmul.f32 %v1933_v7, %v1933_v7 }
 0x2d4   : > { %v1969_v22 = vsel %vm1878_vm2, %v1964_v53, 0.0  ;;  %v1946_v0 = vsel %vm1878_vm2, %v1941_v28, 0.0 }
 0x2d5   : > { %v1970_v62 = vadd.f32 %v1969_v22, %v1968_v45  ;;  %v1947_v21 = vadd.f32 %v1946_v0, %v1945_v15 }
 0x2d7   : > { %v1972_v24 = vadd.f32 %v1971_v14, %v1970_v62  ;;  %v1949_v6 = vadd.f32 %v1948_v30, %v1947_v21 }
 0x2d9   : > { %1973 = vadd.xlane.f32.xlu1 %v1972_v24  ;;  %1950 = vadd.xlane.f32.xlu0 %v1949_v6 }
 0x2da   : > { %2416 = shalt.err (!%p2413_p11)
}
 0x2db   : > { %s2417_s23 = scalar_lea.hbm %s3050_s30, 512  ;;  %s2421_s26 = scalar_lea.hbm %s3106_s2, 1024 }
 0x2dc   : > { %p2418_p0 = scmp.ne.s32.totalorder %s3050_s30, %s2417_s23  ;;  %p2422_p6 = scmp.lt.u32.totalorder %s3050_s30, %s3106_s2 }
 0x2dd   : > { %p2423_p3 = scmp.lt.u32.totalorder %s2421_s26, %s2417_s23  ;;  %p2425_p5 = scmp.lt.u32.totalorder %s2417_s23, %s3050_s30 }
 0x2de   : > { %p2419_p2 = pnand %p2418_p0, %p3122_p12 }
 0x2df   : > { %p2424_p13 = por %p2423_p3, %p2422_p6 }
 0x2e0   : > { %p2420_p7 = pneg %p2419_p2 }
 0x2e1   : > { %p2426_p8 = por %p2425_p5, %p2424_p13 }
 0x2e3   : > { %p2427_p9 = pnand %p2426_p8, %p2420_p7 }
 0x2e5   : > { %2430 = shalt.err (!%p2427_p9)
}
 0x2e6   : > { %s2498_s7 = smov 128   ;;  %s2499_s20 = smov 8   ;;  %vm1960_vm3 = vcmask 0  }
 0x2e7   : > { %2212 = dma.vmem_to_hbm [thread:$0]  (%p3122_p12), %s3052_s9, 512, %s3050_s30, %s1985_s12, %s2498_s7, %s2498_s7, %s2499_s20  }
 0x2e8   : > { %p243_p10 = scmp.lt.s32.totalorder %s2546_s19, 1 }
 0x2ea   : > { %s3130_s19 = smov (!%p243_p10, %s2546_s19), 1 }
 0x2eb   : > { %s245_s9 = scalar_lea.vmem %s3107_s3, %s3130_s19  ;;  %s248_s8 = scalar_lea.vmem %s3108_s4, %s3130_s19 }
 0x366   : > { %v1974_v26 = vpop.xlane.xlu1 %1973  ;;  %v1951_v13 = vpop.xlane.xlu0 %1950 }
 0x367   : > { %v1975_v27 = vrot.slane %v1974_v26, 4  ;;  %v1952_v29 = vrot.slane %v1951_v13, 4 }
 0x369   : > { %v1976_v9 = vadd.f32 %v1975_v27, %v1974_v26  ;;  %v1953_v20 = vadd.f32 %v1952_v29, %v1951_v13 }
 0x36b   : > { %v1977_v12 = vrot.slane %v1976_v9, 2  ;;  %v1954_v42 = vrot.slane %v1953_v20, 2 }
 0x36d   : > { %v1978_v33 = vadd.f32 %v1977_v12, %v1976_v9  ;;  %v1955_v48 = vadd.f32 %v1954_v42, %v1953_v20 }
 0x36f   : > { %v1956_v47 = vrot.slane %v1955_v48, 1  ;;  %v1979_v18 = vrot.slane %v1978_v33, 1 }
 0x371   : > { %v1957_v4 = vadd.f32 %v1956_v47, %v1955_v48  ;;  %v1980_v49 = vadd.f32 %v1979_v18, %v1978_v33 }
 0x373   : > { %2202 = vpush %v1957_v4 }
 0x374   : > { %2204 = vpush %v1980_v49 }
 0x3a4   : > { %s2203_s25 = spop %2202 }
 0x3a5   : > { %v1959_v37 = vstv %s2203_s25  ;;  %s2205_s13 = spop %2204 }
 0x3a6   : > { %1961 = vst.msk [vmem:[%s245_s9] sm:$0x1] %vm1960_vm3, %v1959_v37  ;;  %v1982_v31 = vstv %s2205_s13 }
 0x3a7   : > { %1983 = vst.msk [vmem:[%s248_s8] sm:$0x1] %vm1960_vm3, %v1982_v31 }
 0x3a8 PF: > { %s2025_s14 = sand.u32 1, %s2461_s15   ;;  %p3123_p12 = scmp.ne.s32.totalorder %s3115_s28, 0 }
 0x3a9   : > { %p3124_p1 = scmp.ge.s32.totalorder %s2473_s18, 2  ;;  %s2026_s22 = scalar_lea.sflag [#allocation4], %s2025_s14 }
 0x3ab   : > { %p2223_p4 = pnand %p3124_p1, %p3123_p12 }
 0x3ad   : > { %2456 = dma.done.wait (!%p2223_p4), %s2026_s22, 512  }
 0x3ae   : > { %2458 = vsyncadd (!%p2223_p4), %s2026_s22, 4294966784  ;;  %p19_p11 = scmp.ge.s32.totalorder %s2550_s21, 4   ;;  %s3125_s15 = smov %s2465_s16 }
 0x3af   : > { %s3126_s16 = smov %s2469_s17  ;;  %s3127_s17 = smov %s2562_s24 }
 0x3b0   : > { %s3128_s18 = smov %s2550_s21  ;;  %21 = sbr.rel (!%p19_p11) target bundleno = 6 (0x6), region = 102 }
 0x3b7   :  { %2043 = vsyncpa [#allocation3], 1 }
 0x3b8   :  { %2045 = vsyncpa [#allocation3 + $0x1], 1 }
 0x3b9   :  { %2046 = vsyncpa [#allocation4], 1 }
 0x3ba   :  { %2048 = vsyncpa [#allocation4 + $0x1], 1 }
 0x3bb   :  { %2049 = vsyncpa [#allocation5], 1 }
 0x3bc   :  { %2051 = vsyncpa [#allocation5 + $0x1], 1 }

</bundles_post_ra>
